<compile_context>
chip_gen: v7x
topology: tpu7x:2x2x1
jax: 0.10.0
libtpu: 0.0.40
codegen_flags: <defaults>
</compile_context>

<pallas_src>
import functools

import jax
import jax.numpy as jnp
from jax.experimental import pallas as pl
from jax.experimental.pallas import tpu as pltpu

HIDDEN1 = 1024
HIDDEN2 = 512
OUT_CLASSES = 250
OUT_PADDED = 256  # pad last matmul's N to a lane multiple; slice back in wrapper


def _chip_info():
    """(vmem_capacity_bytes, has_bf16_valu) for the local TPU generation."""
    kind = ""
    try:
        kind = jax.devices()[0].device_kind.lower()
    except Exception:
        pass
    try:
        vmem_cap = int(pltpu.get_tpu_info().vmem_capacity_bytes)
    except Exception:
        vmem_cap = (64 << 20) if "v7" in kind else (128 << 20)
    has_bf16_valu = ("v6" in kind) or ("v7" in kind)  # v5e and older: no bf16 VALU
    return vmem_cap, has_bf16_valu


_VMEM_CAPACITY, _HAS_BF16_VALU = _chip_info()


def _round_up(x, m):
    return ((x + m - 1) // m) * m


def _pick_block_b(B, max_bb=1024):
    """Batch tile: full batch when small; else split so grid >= 2 (dual-TC on v7x),
    growing toward 1024-row tiles for large B to amortize per-grid-step overhead."""
    if B < 256:
        return B  # one full-batch tile (full-extent block, any B allowed)
    bb = _round_up(-(-B // 2), 8)  # ceil(B/2) rounded to sublane multiple
    return min(bb, max_bb)


def _mlp_kernel(x_ref, w1_ref, b1_ref, w2_ref, b2_ref, w3_ref, b3_ref, o_ref,
                *, bf16_epilogue):
    # Dropout(p=0.2) is identity in eval mode (inference semantics).
    # TODO(synk): training-mode dropout (stochastic mask via pltpu.prng_random_bits).
    x = x_ref[...].astype(jnp.bfloat16)  # bf16 MXU operands, f32 accumulation

    h1 = jnp.dot(x, w1_ref[...], preferred_element_type=jnp.float32)
    if bf16_epilogue:  # v6e/v7x: bias + ReLU in packed bf16 (2x VALU throughput)
        h1 = jnp.maximum(h1.astype(jnp.bfloat16) + b1_ref[...].astype(jnp.bfloat16), 0.0)
    else:              # v5e: keep f32 epilogue (no bf16 VALU)
        h1 = jnp.maximum(h1 + b1_ref[...], 0.0).astype(jnp.bfloat16)

    h2 = jnp.dot(h1, w2_ref[...], preferred_element_type=jnp.float32)
    if bf16_epilogue:
        h2 = jnp.maximum(h2.astype(jnp.bfloat16) + b2_ref[...].astype(jnp.bfloat16), 0.0)
    else:
        h2 = jnp.maximum(h2 + b2_ref[...], 0.0).astype(jnp.bfloat16)

    o_ref[...] = (
        jnp.dot(h2, w3_ref[...], preferred_element_type=jnp.float32) + b3_ref[...]
    ).astype(o_ref.dtype)


@functools.partial(jax.jit, static_argnames=("block_b",))
def nn_model_forward(x, params, block_b=None):
    """x: [B, D_in] float32. params: dict of bf16 weights (pre-transposed) + f32 biases."""
    B, D_in = x.shape
    w1, b1 = params["w1"], params["b1"]      # bf16 [D_in, 1024], f32 [1, 1024]
    w2, b2 = params["w2"], params["b2"]      # bf16 [1024, 512],  f32 [1, 512]
    w3, b3 = params["w3"], params["b3"]      # bf16 [512, 256],   f32 [1, 256]  (zero-padded)

    bb = _pick_block_b(B) if block_b is None else min(block_b, B)
    grid = (pl.cdiv(B, bb),)

    # Weights/biases are grid-invariant -> single-buffer them (no pipelining benefit).
    def _const_spec(shape):
        return pl.BlockSpec(shape, lambda i: (0, 0), pipeline_mode=pl.Buffered(1))

    # VMEM budget (no double counting): 1x resident weights, 2x (double-buffered)
    # x/out tiles, plus f32+bf16 copies of the h1/h2 intermediates.
    weight_bytes = 2 * (D_in * HIDDEN1 + HIDDEN1 * HIDDEN2 + HIDDEN2 * OUT_PADDED)  # bf16
    bias_bytes = 4 * (HIDDEN1 + HIDDEN2 + OUT_PADDED)
    io_bytes = 2 * 4 * bb * (D_in + OUT_PADDED)
    interm_bytes = bb * (HIDDEN1 + HIDDEN2) * (4 + 2)
    footprint = weight_bytes + bias_bytes + io_bytes + interm_bytes
    # Chip-aware cap: ~85% of physical VMEM (leaves room for Mosaic internal
    # scratch) and never above 100 MiB even on 128 MiB chips.
    vmem_cap = min(int(0.85 * _VMEM_CAPACITY), 100 << 20)
    vmem_limit = int(max(32 << 20, min(footprint + (8 << 20), vmem_cap)))

    flops = 2 * B * (D_in * HIDDEN1 + HIDDEN1 * HIDDEN2 + HIDDEN2 * OUT_PADDED)
    bytes_accessed = 4 * B * D_in + weight_bytes + bias_bytes + 4 * B * OUT_PADDED
    cost = pl.CostEstimate(flops=flops, transcendentals=0, bytes_accessed=bytes_accessed)

    kernel = functools.partial(_mlp_kernel, bf16_epilogue=_HAS_BF16_VALU)

    out_padded = pl.pallas_call(
        kernel,
        out_shape=jax.ShapeDtypeStruct((B, OUT_PADDED), jnp.float32),
        grid_spec=pltpu.PrefetchScalarGridSpec(
            num_scalar_prefetch=0,
            grid=grid,
            in_specs=[
                pl.BlockSpec((bb, D_in), lambda i: (i, 0)),   # x tile (double-buffered)
                _const_spec((D_in, HIDDEN1)),                 # W1 (resident, 1-buffered)
                _const_spec((1, HIDDEN1)),                    # b1
                _const_spec((HIDDEN1, HIDDEN2)),              # W2
                _const_spec((1, HIDDEN2)),                    # b2
                _const_spec((HIDDEN2, OUT_PADDED)),           # W3 (padded)
                _const_spec((1, OUT_PADDED)),                 # b3 (padded)
            ],
            out_specs=pl.BlockSpec((bb, OUT_PADDED), lambda i: (i, 0)),
        ),
        compiler_params=pltpu.CompilerParams(
            dimension_semantics=("parallel",),
            vmem_limit_bytes=vmem_limit,
        ),
        cost_estimate=cost,
    )(x, w1, b1, w2, b2, w3, b3)

    # TODO(synk): if the consumer accepts 256-wide padded logits, drop this slice
    # (it is a separate XLA copy of the whole BxOUT tensor).
    return out_padded[:, :OUT_CLASSES]


def init_params(key, input_dims):
    """Deterministic init matching nn.Linear shapes (uniform +/-1/sqrt(fan_in)).

    Weights are stored pre-transposed [fan_in, fan_out] and cast to bf16 for the
    MXU; biases stay f32 (cast to bf16 in-kernel only on bf16-VALU chips). The
    final layer is zero-padded 250 -> 256 output columns; the pad is sliced off
    after the kernel.
    """
    ks = jax.random.split(key, 6)

    def lin(kw, kb, fan_in, fan_out):
        bound = 1.0 / jnp.sqrt(jnp.float32(fan_in))
        w = jax.random.uniform(kw, (fan_in, fan_out), jnp.float32, -bound, bound)
        b = jax.random.uniform(kb, (1, fan_out), jnp.float32, -bound, bound)
        return w, b

    w1, b1 = lin(ks[0], ks[1], input_dims, HIDDEN1)
    w2, b2 = lin(ks[2], ks[3], HIDDEN1, HIDDEN2)
    w3, b3 = lin(ks[4], ks[5], HIDDEN2, OUT_CLASSES)

    w3_pad = jnp.zeros((HIDDEN2, OUT_PADDED), jnp.float32).at[:, :OUT_CLASSES].set(w3)
    b3_pad = jnp.zeros((1, OUT_PADDED), jnp.float32).at[:, :OUT_CLASSES].set(b3)

    return {
        "w1": w1.astype(jnp.bfloat16), "b1": b1,
        "w2": w2.astype(jnp.bfloat16), "b2": b2,
        "w3": w3_pad.astype(jnp.bfloat16), "b3": b3_pad,
    }


def _reference(x, params, bf16_epilogue=_HAS_BF16_VALU):
    """Pure-JAX reference with the same bf16-operand / f32-accumulate / chip-gated
    epilogue recipe as the kernel."""
    bf16 = jnp.bfloat16

    def bias_relu(acc_f32, b):
        if bf16_epilogue:
            return jnp.maximum(acc_f32.astype(bf16) + b.astype(bf16), 0.0)
        return jnp.maximum(acc_f32 + b, 0.0).astype(bf16)

    h1 = bias_relu(
        jnp.dot(x.astype(bf16), params["w1"], preferred_element_type=jnp.float32),
        params["b1"])
    h2 = bias_relu(
        jnp.dot(h1, params["w2"], preferred_element_type=jnp.float32),
        params["b2"])
    out = jnp.dot(h2, params["w3"], preferred_element_type=jnp.float32) + params["b3"]
    return out[:, :OUT_CLASSES]


if __name__ == "__main__":
    key = jax.random.PRNGKey(0)
    k_x, k_p, k_x2 = jax.random.split(key, 3)

    # Small-batch path (single full-batch tile).
    B, D_IN = 32, 128
    x = jax.random.normal(k_x, (B, D_IN), jnp.float32)
    params = init_params(k_p, D_IN)

    out = jax.block_until_ready(nn_model_forward(x, params))
    ref = _reference(x, params)
    assert out.shape == (B, OUT_CLASSES), out.shape
    assert jnp.allclose(out, ref, atol=2e-2, rtol=2e-2), "mismatch vs JAX reference (small batch)"

    # Multi-tile path: B=512 -> bb=256, grid=(2,) ("parallel" axis -> dual-TC on v7x).
    B2 = 512
    x2 = jax.random.normal(k_x2, (B2, D_IN), jnp.float32)
    out2 = jax.block_until_ready(nn_model_forward(x2, params))
    ref2 = _reference(x2, params)
    assert out2.shape == (B2, OUT_CLASSES), out2.shape
    assert jnp.allclose(out2, ref2, atol=2e-2, rtol=2e-2), "mismatch vs JAX reference (multi-tile)"

    print("KERNEL_OK")
</pallas_src>

<mosaic_0001>
module attributes {stable_mosaic.version = 11 : i64} {
  func.func @_mlp_kernel(%arg0: i32, %arg1: memref<32x128xf32, #tpu.memory_space<vmem>>, %arg2: memref<128x1024xbf16, #tpu.memory_space<vmem>>, %arg3: memref<1x1024xf32, #tpu.memory_space<vmem>>, %arg4: memref<1024x512xbf16, #tpu.memory_space<vmem>>, %arg5: memref<1x512xf32, #tpu.memory_space<vmem>>, %arg6: memref<512x256xbf16, #tpu.memory_space<vmem>>, %arg7: memref<1x256xf32, #tpu.memory_space<vmem>>, %arg8: memref<32x256xf32, #tpu.memory_space<vmem>>) attributes {dimension_semantics = [#tpu.dimension_semantics<parallel>], iteration_bounds = array<i64: 1>, scalar_prefetch = 0 : i64, scratch_operands = 0 : i64, tpu.core_type = #tpu.core_type<tc>, window_params = [{transform_indices = @transform_0, window_bounds = array<i64: 32, 128>}, {pipeline_mode = #tpu.pipeline_mode<synchronous>, transform_indices = @transform_1, window_bounds = array<i64: 128, 1024>}, {pipeline_mode = #tpu.pipeline_mode<synchronous>, transform_indices = @transform_2, window_bounds = array<i64: 1, 1024>}, {pipeline_mode = #tpu.pipeline_mode<synchronous>, transform_indices = @transform_3, window_bounds = array<i64: 1024, 512>}, {pipeline_mode = #tpu.pipeline_mode<synchronous>, transform_indices = @transform_4, window_bounds = array<i64: 1, 512>}, {pipeline_mode = #tpu.pipeline_mode<synchronous>, transform_indices = @transform_5, window_bounds = array<i64: 512, 256>}, {pipeline_mode = #tpu.pipeline_mode<synchronous>, transform_indices = @transform_6, window_bounds = array<i64: 1, 256>}, {transform_indices = @transform_7, window_bounds = array<i64: 32, 256>}]} {
    %c0 = arith.constant 0 : index
    %c0_0 = arith.constant 0 : index
    %0 = vector.load %arg1[%c0, %c0_0] : memref<32x128xf32, #tpu.memory_space<vmem>>, vector<32x128xf32>
    %1 = arith.truncf %0 : vector<32x128xf32> to vector<32x128xbf16>
    %c0_1 = arith.constant 0 : index
    %c0_2 = arith.constant 0 : index
    %2 = vector.load %arg2[%c0_1, %c0_2] : memref<128x1024xbf16, #tpu.memory_space<vmem>>, vector<128x1024xbf16>
    %cst = arith.constant dense<0.000000e+00> : vector<32x1024xf32>
    %3 = tpu.matmul %1, %2, %cst {dimension_numbers = #tpu.dot_dimension_numbers<[1], [0], [0], [1], [0, 0, 1, 1], [], []>} : vector<32x128xbf16>, vector<128x1024xbf16>, vector<32x1024xf32> -> vector<32x1024xf32>
    %c0_3 = arith.constant 0 : index
    %c0_4 = arith.constant 0 : index
    %4 = vector.load %arg3[%c0_3, %c0_4] : memref<1x1024xf32, #tpu.memory_space<vmem>>, vector<1x1024xf32>
    %5 = vector.broadcast %4 : vector<1x1024xf32> to vector<32x1024xf32>
    %6 = arith.addf %3, %5 : vector<32x1024xf32>
    %cst_5 = arith.constant 0.000000e+00 : f32
    %7 = vector.broadcast %cst_5 : f32 to vector<32x1024xf32>
    %8 = arith.maximumf %6, %7 : vector<32x1024xf32>
    %9 = arith.truncf %8 : vector<32x1024xf32> to vector<32x1024xbf16>
    %c0_6 = arith.constant 0 : index
    %c0_7 = arith.constant 0 : index
    %10 = vector.load %arg4[%c0_6, %c0_7] : memref<1024x512xbf16, #tpu.memory_space<vmem>>, vector<1024x512xbf16>
    %cst_8 = arith.constant dense<0.000000e+00> : vector<32x512xf32>
    %11 = tpu.matmul %9, %10, %cst_8 {dimension_numbers = #tpu.dot_dimension_numbers<[1], [0], [0], [1], [0, 0, 1, 1], [], []>} : vector<32x1024xbf16>, vector<1024x512xbf16>, vector<32x512xf32> -> vector<32x512xf32>
    %c0_9 = arith.constant 0 : index
    %c0_10 = arith.constant 0 : index
    %12 = vector.load %arg5[%c0_9, %c0_10] : memref<1x512xf32, #tpu.memory_space<vmem>>, vector<1x512xf32>
    %13 = vector.broadcast %12 : vector<1x512xf32> to vector<32x512xf32>
    %14 = arith.addf %11, %13 : vector<32x512xf32>
    %cst_11 = arith.constant 0.000000e+00 : f32
    %15 = vector.broadcast %cst_11 : f32 to vector<32x512xf32>
    %16 = arith.maximumf %14, %15 : vector<32x512xf32>
    %17 = arith.truncf %16 : vector<32x512xf32> to vector<32x512xbf16>
    %c0_12 = arith.constant 0 : index
    %c0_13 = arith.constant 0 : index
    %18 = vector.load %arg6[%c0_12, %c0_13] : memref<512x256xbf16, #tpu.memory_space<vmem>>, vector<512x256xbf16>
    %cst_14 = arith.constant dense<0.000000e+00> : vector<32x256xf32>
    %19 = tpu.matmul %17, %18, %cst_14 {dimension_numbers = #tpu.dot_dimension_numbers<[1], [0], [0], [1], [0, 0, 1, 1], [], []>} : vector<32x512xbf16>, vector<512x256xbf16>, vector<32x256xf32> -> vector<32x256xf32>
    %c0_15 = arith.constant 0 : index
    %c0_16 = arith.constant 0 : index
    %20 = vector.load %arg7[%c0_15, %c0_16] : memref<1x256xf32, #tpu.memory_space<vmem>>, vector<1x256xf32>
    %21 = vector.broadcast %20 : vector<1x256xf32> to vector<32x256xf32>
    %22 = arith.addf %19, %21 : vector<32x256xf32>
    %c0_17 = arith.constant 0 : index
    %c0_18 = arith.constant 0 : index
    %23 = vector.load %arg8[%c0_17, %c0_18] : memref<32x256xf32, #tpu.memory_space<vmem>>, vector<32x256xf32>
    tpu.vector_store %arg8[%c0_17, %c0_18], %22 {strides = array<i32>} : memref<32x256xf32, #tpu.memory_space<vmem>>, vector<32x256xf32>,
    return
  }
  func.func @transform_0(%arg0: i32) -> (i32, i32) {
    %c0_i32 = arith.constant 0 : i32
    %c0_i32_0 = arith.constant 0 : i32
    return %arg0, %c0_i32 : i32, i32
  }
  func.func @transform_1(%arg0: i32) -> (i32, i32) {
    %c0_i32 = arith.constant 0 : i32
    %c0_i32_0 = arith.constant 0 : i32
    %c0_i32_1 = arith.constant 0 : i32
    return %c0_i32, %c0_i32_0 : i32, i32
  }
  func.func @transform_2(%arg0: i32) -> (i32, i32) {
    %c0_i32 = arith.constant 0 : i32
    %c0_i32_0 = arith.constant 0 : i32
    %c0_i32_1 = arith.constant 0 : i32
    return %c0_i32, %c0_i32_0 : i32, i32
  }
  func.func @transform_3(%arg0: i32) -> (i32, i32) {
    %c0_i32 = arith.constant 0 : i32
    %c0_i32_0 = arith.constant 0 : i32
    %c0_i32_1 = arith.constant 0 : i32
    return %c0_i32, %c0_i32_0 : i32, i32
  }
  func.func @transform_4(%arg0: i32) -> (i32, i32) {
    %c0_i32 = arith.constant 0 : i32
    %c0_i32_0 = arith.constant 0 : i32
    %c0_i32_1 = arith.constant 0 : i32
    return %c0_i32, %c0_i32_0 : i32, i32
  }
  func.func @transform_5(%arg0: i32) -> (i32, i32) {
    %c0_i32 = arith.constant 0 : i32
    %c0_i32_0 = arith.constant 0 : i32
    %c0_i32_1 = arith.constant 0 : i32
    return %c0_i32, %c0_i32_0 : i32, i32
  }
  func.func @transform_6(%arg0: i32) -> (i32, i32) {
    %c0_i32 = arith.constant 0 : i32
    %c0_i32_0 = arith.constant 0 : i32
    %c0_i32_1 = arith.constant 0 : i32
    return %c0_i32, %c0_i32_0 : i32, i32
  }
  func.func @transform_7(%arg0: i32) -> (i32, i32) {
    %c0_i32 = arith.constant 0 : i32
    %c0_i32_0 = arith.constant 0 : i32
    return %arg0, %c0_i32 : i32, i32
  }
}

</mosaic_0001>

<bundles_post_ra>
// kernel: nn_model_forward.1
= control target key start
LH: loop header
LB: loop body
LE: loop exit
PB: predicated region body
PF: predicated region fallthrough
CT: control target
= control target key end

     0   :  { %12 = vsyncpa [#allocation3], 0  ;;  %s4733_s0 = inlined_call_operand.hbm [shape: f32[32,128], index: 0, kind: input, shape index: {}]   ;;  %s4734_s1 = inlined_call_operand.hbm [shape: bf16[128,1024], index: 1, kind: input, shape index: {}]   ;;  %s4735_s2 = inlined_call_operand.hbm [shape: f32[1,1024], index: 2, kind: input, shape index: {}]   ;;  %s4736_s3 = inlined_call_operand.hbm [shape: bf16[1024,512], index: 3, kind: input, shape index: {}]   ;;  %s4737_s4 = inlined_call_operand.vmem [shape: f32[1,512], index: 4, kind: input, shape index: {}]   ;;  %s4738_s5 = inlined_call_operand.hbm [shape: bf16[512,256], index: 5, kind: input, shape index: {}]   ;;  %s4739_s6 = inlined_call_operand.vmem [shape: f32[1,256], index: 6, kind: input, shape index: {}]   ;;  %s4740_s7 = inlined_call_operand.hbm [shape: f32[32,256], index: 7, kind: output, shape index: {}]  }
   0x1   :  { %13 = vsyncpa [#allocation6], 0 }
   0x2   :  { %14 = vsyncpa [#allocation9], 0 }
   0x3   :  { %15 = vsyncpa [#allocation4], 0  ;;  %s4418_s24 = smov [#allocation5]   ;;  %s4278_s28 = scalar_lea.hbm %s4734_s1, 8192 }
   0x4   :  { %s33_s25 = sshll.u32 %s4418_s24, 4  ;;  %p4279_p0 = scmp.ne.s32.totalorder %s4734_s1, %s4278_s28  ;;  %s34_s25 = int_to_ptr.vmem [resolvable:$true] %s33_s25 }
   0x5   :  { %p4282_p1 = scmp.lt.u32.totalorder %s4278_s28, %s4734_s1 }
   0x7   :  { %p4284_p2 = pnand %p4282_p1, %p4279_p0 }
   0x9   :  { %4287 = shalt.err (!%p4284_p2)
}
   0xa   :  { %s4288_s10 = scalar_lea.vmem %s34_s25, 8192  ;;  %p4293_p4 = scmp.lt.s32.totalorder %s34_s25, %s34_s25 }
   0xb   :  { %p4289_p3 = scmp.ne.s32.totalorder %s34_s25, %s4288_s10  ;;  %p4294_p5 = scmp.lt.s32.totalorder %s4288_s10, %s4288_s10 }
   0xd   :  { %p4295_p6 = por %p4294_p5, %p4293_p4 }
   0xf   :  { %p4296_p7 = pnand %p4295_p6, %p4289_p3 }
  0x11   :  { %4299 = shalt.err (!%p4296_p7)
}
  0x12   :  { %s4419_s11 = smov 512   ;;  %s4420_s12 = smov 32  }
  0x13   :  { %39 = dma.hbm_to_vmem [thread:$0]  %s4734_s1, 8192, %s34_s25, [#allocation6], %s4419_s11, %s4419_s11, %s4420_s12  }
  0x14   :  { %s4421_s15 = smov [#allocation8]   ;;  %s4300_s19 = scalar_lea.hbm %s4736_s3, 32768 }
  0x15   :  { %s55_s16 = sshll.u32 %s4421_s15, 4  ;;  %p4301_p8 = scmp.ne.s32.totalorder %s4736_s3, %s4300_s19  ;;  %s56_s16 = int_to_ptr.vmem [resolvable:$true] %s55_s16 }
  0x16   :  { %p4304_p9 = scmp.lt.u32.totalorder %s4300_s19, %s4736_s3 }
  0x18   :  { %p4306_p10 = pnand %p4304_p9, %p4301_p8 }
  0x1a   :  { %4309 = shalt.err (!%p4306_p10)
}
  0x1b   :  { %s4310_s24 = scalar_lea.vmem %s56_s16, 32768  ;;  %p4315_p12 = scmp.lt.s32.totalorder %s56_s16, %s56_s16 }
  0x1c   :  { %p4311_p11 = scmp.ne.s32.totalorder %s56_s16, %s4310_s24  ;;  %p4316_p13 = scmp.lt.s32.totalorder %s4310_s24, %s4310_s24 }
  0x1e   :  { %p4317_p0 = por %p4316_p13, %p4315_p12 }
  0x20   :  { %p4318_p1 = pnand %p4317_p0, %p4311_p11 }
  0x22   :  { %4321 = shalt.err (!%p4318_p1)
}
  0x23   :  { %s4422_s1 = smov 256   ;;  %s4423_s25 = smov 16  }
  0x24   :  { %61 = dma.hbm_to_vmem [thread:$0]  %s4736_s3, 32768, %s56_s16, [#allocation9], %s4422_s1, %s4422_s1, %s4423_s25  }
  0x25   :  { %s4424_s28 = smov [#allocation2]   ;;  %s4322_s9 = scalar_lea.hbm %s4733_s0, 512 }
  0x26   :  { %s21_s29 = sshll.u32 %s4424_s28, 4  ;;  %p4323_p2 = scmp.ne.s32.totalorder %s4733_s0, %s4322_s9  ;;  %s22_s29 = int_to_ptr.vmem [resolvable:$true] %s21_s29 }
  0x27   :  { %p4326_p3 = scmp.lt.u32.totalorder %s4322_s9, %s4733_s0 }
  0x29   :  { %p4328_p4 = pnand %p4326_p3, %p4323_p2 }
  0x2b   :  { %4331 = shalt.err (!%p4328_p4)
}
  0x2c   :  { %s4332_s14 = scalar_lea.vmem %s22_s29, 512  ;;  %p4337_p6 = scmp.lt.s32.totalorder %s22_s29, %s22_s29 }
  0x2d   :  { %p4333_p5 = scmp.ne.s32.totalorder %s22_s29, %s4332_s14  ;;  %p4338_p7 = scmp.lt.s32.totalorder %s4332_s14, %s4332_s14 }
  0x2f   :  { %p4339_p8 = por %p4338_p7, %p4337_p6 }
  0x31   :  { %p4340_p9 = pnand %p4339_p8, %p4333_p5 }
  0x33   :  { %4343 = shalt.err (!%p4340_p9)
}
  0x34   :  { %s4425_s3 = smov 128   ;;  %s4426_s15 = smov 8  }
  0x35   :  { %27 = dma.hbm_to_vmem [thread:$0]  %s4733_s0, 512, %s22_s29, [#allocation3], %s4425_s3, %s4425_s3, %s4426_s15  }
  0x36   :  { %s4427_s18 = smov [#allocation7]   ;;  %s4428_s20 = smov [#allocation10]  }
  0x37   :  { %s46_s19 = sshll.u32 %s4427_s18, 4  ;;  %s69_s21 = sshll.u32 %s4428_s20, 4  ;;  %s47_s19 = int_to_ptr.vmem [resolvable:$true] %s46_s19  ;;  %s70_s21 = int_to_ptr.vmem [resolvable:$true] %s69_s21 }
  0x38   :  { %s4344_s24 = scalar_lea.hbm %s4735_s2, 128 }
  0x39   :  { %p4345_p10 = scmp.ne.s32.totalorder %s4735_s2, %s4344_s24  ;;  %p4348_p11 = scmp.lt.u32.totalorder %s4344_s24, %s4735_s2 }
  0x3b   :  { %p4350_p12 = pnand %p4348_p11, %p4345_p10 }
  0x3d   :  { %4353 = shalt.err (!%p4350_p12)
}
  0x3e   :  { %s4354_s0 = scalar_lea.vmem %s47_s19, 128  ;;  %p4359_p0 = scmp.lt.s32.totalorder %s47_s19, %s47_s19 }
  0x3f   :  { %p4355_p13 = scmp.ne.s32.totalorder %s47_s19, %s4354_s0  ;;  %p4360_p1 = scmp.lt.s32.totalorder %s4354_s0, %s4354_s0 }
  0x41   :  { %p4361_p2 = por %p4360_p1, %p4359_p0 }
  0x43   :  { %p4362_p3 = pnand %p4361_p2, %p4355_p13 }
  0x45   :  { %4365 = shalt.err (!%p4362_p3)
}
  0x46   :  { %49 = dma.hbm_to_vmem [thread:$0]  %s4735_s2, 128, %s47_s19, [#allocation6]  }
  0x47   :  { %s4366_s11 = scalar_lea.hbm %s4738_s5, 8192 }
  0x48   :  { %p4367_p4 = scmp.ne.s32.totalorder %s4738_s5, %s4366_s11  ;;  %p4370_p5 = scmp.lt.u32.totalorder %s4366_s11, %s4738_s5 }
  0x4a   :  { %p4372_p6 = pnand %p4370_p5, %p4367_p4 }
  0x4c   :  { %4375 = shalt.err (!%p4372_p6)
}
  0x4d   :  { %s4376_s17 = scalar_lea.vmem %s70_s21, 8192  ;;  %p4381_p8 = scmp.lt.s32.totalorder %s70_s21, %s70_s21 }
  0x4e   :  { %p4377_p7 = scmp.ne.s32.totalorder %s70_s21, %s4376_s17  ;;  %p4382_p9 = scmp.lt.s32.totalorder %s4376_s17, %s4376_s17 }
  0x50   :  { %p4383_p10 = por %p4382_p9, %p4381_p8 }
  0x52   :  { %p4384_p11 = pnand %p4383_p10, %p4377_p7 }
  0x54   :  { %4387 = shalt.err (!%p4384_p11)
}
  0x55   :  { %75 = dma.hbm_to_vmem [thread:$0]  %s4738_s5, 8192, %s70_s21, [#allocation9], %s4425_s3, %s4425_s3, %s4426_s15  }
  0x56   :  { %4410 = dma.done.wait [#allocation3], 512  }
  0x57   :  { %4411 = vsyncadd [#allocation3], 4294966784 }
  0x58   :  { %4412 = dma.done.wait [#allocation6], 8320  }
  0x59   :  { %4413 = vsyncadd [#allocation6], 4294958976 }
  0x5a   :  { %4414 = dma.done.wait [#allocation9], 40960  }
  0x5b   :  { %4415 = vsyncadd [#allocation9], 4294926336  ;;  %v4429_v0 = vmov 0   ;;  %v100_v1 = vld [vmem:[#allocation5] sm:$0xff]  ;;  %v101_v3 = vld [vmem:[#allocation5 + $0x8] sm:$0xff] }
  0x5c   :  { %558 = vmatprep.mubr.bf16.mxu0 %v4429_v0  ;;  %611 = vmatprep.mubr.bf16.mxu1 %v4429_v0  ;;  %v104_v2 = vld [vmem:[#allocation5 + $0x20] sm:$0xff]  ;;  %v105_v5 = vld [vmem:[#allocation5 + $0x28] sm:$0xff] }
  0x5d   :  { %v3322_v4 = vcombine.high %v100_v1, %v104_v2  ;;  %v3321_v6 = vcombine.low %v100_v1, %v104_v2  ;;  %v108_v7 = vld [vmem:[#allocation5 + $0x40] sm:$0xff]  ;;  %v3324_v9 = vcombine.high %v101_v3, %v105_v5  ;;  %v3323_v10 = vcombine.low %v101_v3, %v105_v5  ;;  %v109_v12 = vld [vmem:[#allocation5 + $0x48] sm:$0xff]  ;;  %v102_v1 = vld [vmem:[#allocation5 + $0x10] sm:$0xff] }
  0x5e   :  { %v112_v8 = vld [vmem:[#allocation5 + $0x60] sm:$0xff]  ;;  %v113_v13 = vld [vmem:[#allocation5 + $0x68] sm:$0xff]  ;;  %v106_v2 = vld [vmem:[#allocation5 + $0x30] sm:$0xff] }
  0x5f   :  { %v3330_v11 = vcombine.high %v108_v7, %v112_v8  ;;  %v116_v14 = vld [vmem:[#allocation5 + $0x80] sm:$0xff]  ;;  %526 = vmatprep.subr.bf16.mxu0 %v3322_v4  ;;  %v3332_v15 = vcombine.high %v109_v12, %v113_v13  ;;  %v117_v17 = vld [vmem:[#allocation5 + $0x88] sm:$0xff]  ;;  %579 = vmatprep.subr.bf16.mxu1 %v3324_v9  ;;  %v3329_v19 = vcombine.low %v108_v7, %v112_v8  ;;  %v103_v3 = vld [vmem:[#allocation5 + $0x18] sm:$0xff] }
  0x60   :  { %v120_v16 = vld [vmem:[#allocation5 + $0xa0] sm:$0xff]  ;;  %v121_v18 = vld [vmem:[#allocation5 + $0xa8] sm:$0xff]  ;;  %527 = vmatpush1.bf16.msra.mxu0 %v3321_v6  ;;  %580 = vmatpush1.bf16.msra.mxu1 %v3323_v10  ;;  %v3331_v20 = vcombine.low %v109_v12, %v113_v13  ;;  %v107_v4 = vld [vmem:[#allocation5 + $0x38] sm:$0xff]  ;;  %v3326_v8 = vcombine.high %v102_v1, %v106_v2 }
  0x61   :  { %528 = vmatprep.subr.bf16.mxu0 %v3330_v11  ;;  %v3338_v21 = vcombine.high %v116_v14, %v120_v16  ;;  %581 = vmatprep.subr.bf16.mxu1 %v3332_v15  ;;  %v3340_v22 = vcombine.high %v117_v17, %v121_v18  ;;  %v124_v23 = vld [vmem:[#allocation5 + $0xc0] sm:$0xff]  ;;  %v125_v25 = vld [vmem:[#allocation5 + $0xc8] sm:$0xff]  ;;  %v3337_v27 = vcombine.low %v116_v14, %v120_v16  ;;  %v110_v9 = vld [vmem:[#allocation5 + $0x50] sm:$0xff] }
  0x62   :  { %v128_v24 = vld [vmem:[#allocation5 + $0xe0] sm:$0xff]  ;;  %v129_v26 = vld [vmem:[#allocation5 + $0xe8] sm:$0xff]  ;;  %v3339_v28 = vcombine.low %v117_v17, %v121_v18  ;;  %v3328_v10 = vcombine.high %v103_v3, %v107_v4  ;;  %v114_v12 = vld [vmem:[#allocation5 + $0x70] sm:$0xff]  ;;  %v3325_v15 = vcombine.low %v102_v1, %v106_v2 }
  0x63   :  { %v3346_v29 = vcombine.high %v124_v23, %v128_v24  ;;  %v3348_v30 = vcombine.high %v125_v25, %v129_v26  ;;  %v132_v31 = vld [vmem:[#allocation5 + $0x100] sm:$0xff]  ;;  %v133_v33 = vld [vmem:[#allocation5 + $0x108] sm:$0xff]  ;;  %v3345_v35 = vcombine.low %v124_v23, %v128_v24  ;;  %v3347_v36 = vcombine.low %v125_v25, %v129_v26  ;;  %v111_v13 = vld [vmem:[#allocation5 + $0x58] sm:$0xff] }
  0x64   :  { %529 = vmatpush1.bf16.msra.mxu0 %v3329_v19  ;;  %582 = vmatpush1.bf16.msra.mxu1 %v3331_v20  ;;  %v136_v32 = vld [vmem:[#allocation5 + $0x120] sm:$0xff]  ;;  %v137_v34 = vld [vmem:[#allocation5 + $0x128] sm:$0xff]  ;;  %v115_v14 = vld [vmem:[#allocation5 + $0x78] sm:$0xff]  ;;  %v3334_v18 = vcombine.high %v110_v9, %v114_v12  ;;  %v3327_v20 = vcombine.low %v103_v3, %v107_v4  ;;  %v3333_v25 = vcombine.low %v110_v9, %v114_v12 }
  0x65   :  { %530 = vmatprep.subr.bf16.mxu0 %v3338_v21  ;;  %583 = vmatprep.subr.bf16.mxu1 %v3340_v22  ;;  %v3354_v37 = vcombine.high %v132_v31, %v136_v32  ;;  %v3356_v38 = vcombine.high %v133_v33, %v137_v34  ;;  %v140_v39 = vld [vmem:[#allocation5 + $0x140] sm:$0xff]  ;;  %v141_v41 = vld [vmem:[#allocation5 + $0x148] sm:$0xff]  ;;  %v3353_v43 = vcombine.low %v132_v31, %v136_v32  ;;  %v96_v16 = vld [vmem:[#allocation2 + $0x10] sm:$0xff] }
  0x66   :  { %v144_v40 = vld [vmem:[#allocation5 + $0x160] sm:$0xff]  ;;  %v145_v42 = vld [vmem:[#allocation5 + $0x168] sm:$0xff]  ;;  %v3355_v44 = vcombine.low %v133_v33, %v137_v34  ;;  %v97_v17 = vld [vmem:[#allocation2 + $0x18] sm:$0xff]  ;;  %v3336_v22 = vcombine.high %v111_v13, %v115_v14 }
  0x67   :  { %v3362_v45 = vcombine.high %v140_v39, %v144_v40  ;;  %v3364_v46 = vcombine.high %v141_v41, %v145_v42  ;;  %v148_v47 = vld [vmem:[#allocation5 + $0x180] sm:$0xff]  ;;  %v149_v49 = vld [vmem:[#allocation5 + $0x188] sm:$0xff]  ;;  %v3361_v51 = vcombine.low %v140_v39, %v144_v40  ;;  %v3363_v52 = vcombine.low %v141_v41, %v145_v42  ;;  %v118_v19 = vld [vmem:[#allocation5 + $0x90] sm:$0xff] }
  0x68   :  { %531 = vmatpush1.bf16.msra.mxu0 %v3337_v27  ;;  %584 = vmatpush1.bf16.msra.mxu1 %v3339_v28  ;;  %v152_v48 = vld [vmem:[#allocation5 + $0x1a0] sm:$0xff]  ;;  %v153_v50 = vld [vmem:[#allocation5 + $0x1a8] sm:$0xff]  ;;  %v122_v21 = vld [vmem:[#allocation5 + $0xb0] sm:$0xff]  ;;  %v3335_v28 = vcombine.low %v111_v13, %v115_v14 }
  0x69   :  { %532 = vmatprep.subr.bf16.mxu0 %v3346_v29  ;;  %585 = vmatprep.subr.bf16.mxu1 %v3348_v30  ;;  %v3370_v53 = vcombine.high %v148_v47, %v152_v48  ;;  %v3372_v54 = vcombine.high %v149_v49, %v153_v50  ;;  %v156_v55 = vld [vmem:[#allocation5 + $0x1c0] sm:$0xff]  ;;  %v157_v57 = vld [vmem:[#allocation5 + $0x1c8] sm:$0xff]  ;;  %v3369_v59 = vcombine.low %v148_v47, %v152_v48  ;;  %v119_v23 = vld [vmem:[#allocation5 + $0x98] sm:$0xff] }
  0x6a   :  { %v160_v56 = vld [vmem:[#allocation5 + $0x1e0] sm:$0xff]  ;;  %v161_v58 = vld [vmem:[#allocation5 + $0x1e8] sm:$0xff]  ;;  %v3371_v60 = vcombine.low %v149_v49, %v153_v50  ;;  %v123_v24 = vld [vmem:[#allocation5 + $0xb8] sm:$0xff]  ;;  %v3342_v26 = vcombine.high %v118_v19, %v122_v21  ;;  %v4548_v29 = vpack.c.bf16 %v97_v17, %v96_v16  ;;  %v3341_v34 = vcombine.low %v118_v19, %v122_v21 }
  0x6b   :  { %v3378_v61 = vcombine.high %v156_v55, %v160_v56  ;;  %v3380_v62 = vcombine.high %v157_v57, %v161_v58  ;;  %v94_v63 = vld [vmem:[#allocation2] sm:$0xff]  ;;  %v3377_v5 = vcombine.low %v156_v55, %v160_v56  ;;  %v95_v6 = vld [vmem:[#allocation2 + $0x8] sm:$0xff]  ;;  %v3379_v7 = vcombine.low %v157_v57, %v161_v58  ;;  %v126_v27 = vld [vmem:[#allocation5 + $0xd0] sm:$0xff] }
  0x6c   :  { %533 = vmatpush1.bf16.msra.mxu0 %v3345_v35  ;;  %586 = vmatpush1.bf16.msra.mxu1 %v3347_v36  ;;  %v4542_v11 = vpack.c.bf16 %v95_v6, %v94_v63  ;;  %v130_v30 = vld [vmem:[#allocation5 + $0xf0] sm:$0xff]  ;;  %v3344_v31 = vcombine.high %v119_v23, %v123_v24  ;;  %v127_v32 = vld [vmem:[#allocation5 + $0xd8] sm:$0xff] }
  0x6d   :  { %534 = vmatprep.subr.bf16.mxu0 %v3354_v37  ;;  %587 = vmatprep.subr.bf16.mxu1 %v3356_v38  ;;  %v131_v33 = vld [vmem:[#allocation5 + $0xf8] sm:$0xff]  ;;  %v3350_v35 = vcombine.high %v126_v27, %v130_v30  ;;  %v134_v36 = vld [vmem:[#allocation5 + $0x110] sm:$0xff]  ;;  %v3343_v37 = vcombine.low %v119_v23, %v123_v24  ;;  %v3349_v42 = vcombine.low %v126_v27, %v130_v30 }
  0x6e   :  { %v138_v38 = vld [vmem:[#allocation5 + $0x130] sm:$0xff]  ;;  %v3352_v39 = vcombine.high %v127_v32, %v131_v33  ;;  %v135_v40 = vld [vmem:[#allocation5 + $0x118] sm:$0xff] }
  0x6f   :  { %v139_v41 = vld [vmem:[#allocation5 + $0x138] sm:$0xff]  ;;  %v3357_v50 = vcombine.low %v134_v36, %v138_v38 }
  0x70   :  { %535 = vmatpush1.bf16.msra.mxu0 %v3353_v43  ;;  %588 = vmatpush1.bf16.msra.mxu1 %v3355_v44  ;;  %v3358_v43 = vcombine.high %v134_v36, %v138_v38  ;;  %v142_v44 = vld [vmem:[#allocation5 + $0x150] sm:$0xff]  ;;  %v3360_v47 = vcombine.high %v135_v40, %v139_v41  ;;  %v143_v48 = vld [vmem:[#allocation5 + $0x158] sm:$0xff] }
  0x71   :  { %536 = vmatprep.subr.bf16.mxu0 %v3362_v45  ;;  %589 = vmatprep.subr.bf16.mxu1 %v3364_v46  ;;  %v3351_v45 = vcombine.low %v127_v32, %v131_v33  ;;  %v146_v46 = vld [vmem:[#allocation5 + $0x170] sm:$0xff]  ;;  %v147_v49 = vld [vmem:[#allocation5 + $0x178] sm:$0xff] }
  0x72   :  { %v3368_v55 = vcombine.high %v143_v48, %v147_v49  ;;  %v151_v56 = vld [vmem:[#allocation5 + $0x198] sm:$0xff]  ;;  %v3365_v58 = vcombine.low %v142_v44, %v146_v46 }
  0x73   :  { %v155_v57 = vld [vmem:[#allocation5 + $0x1b8] sm:$0xff] }
  0x74   :  { %537 = vmatpush1.bf16.msra.mxu0 %v3361_v51  ;;  %590 = vmatpush1.bf16.msra.mxu1 %v3363_v52  ;;  %v3366_v51 = vcombine.high %v142_v44, %v146_v46  ;;  %v150_v52 = vld [vmem:[#allocation5 + $0x190] sm:$0xff]  ;;  %v3376_v63 = vcombine.high %v151_v56, %v155_v57  ;;  %v159_v1 = vld [vmem:[#allocation5 + $0x1d8] sm:$0xff] }
  0x75   :  { %538 = vmatprep.subr.bf16.mxu0 %v3370_v53  ;;  %591 = vmatprep.subr.bf16.mxu1 %v3372_v54  ;;  %v3359_v53 = vcombine.low %v135_v40, %v139_v41  ;;  %v154_v54 = vld [vmem:[#allocation5 + $0x1b0] sm:$0xff]  ;;  %v163_v2 = vld [vmem:[#allocation5 + $0x1f8] sm:$0xff] }
  0x76   :  { %v3373_v3 = vcombine.low %v150_v52, %v154_v54  ;;  %v3384_v6 = vcombine.high %v159_v1, %v163_v2  ;;  %v3800_v9 = vld [vmem:[#allocation8 + $0x4] ss:$16 sps:$4 sm:$0xff]   ;;  %v3798_v12 = vld [vmem:[#allocation8] ss:$16 sps:$4 sm:$0xff]  }
  0x77   :  { %v3801_v13 = vld [vmem:[#allocation8 + $0x200] ss:$16 sps:$4 sm:$0xff]   ;;  %v3806_v14 = vld [vmem:[#allocation8 + $0x24] ss:$16 sps:$4 sm:$0xff]  }
  0x78   :  { %539 = vmatpush1.bf16.msra.mxu0 %v3369_v59  ;;  %592 = vmatpush1.bf16.msra.mxu1 %v3371_v60  ;;  %v3374_v59 = vcombine.high %v150_v52, %v154_v54  ;;  %v158_v60 = vld [vmem:[#allocation5 + $0x1d0] sm:$0xff]  ;;  %v3804_v16 = vld [vmem:[#allocation8 + $0x20] ss:$16 sps:$4 sm:$0xff]   ;;  %v3815_v19 = vld [vmem:[#allocation8 + $0x244] ss:$16 sps:$4 sm:$0xff]  }
  0x79   :  { %540 = vmatprep.subr.bf16.mxu0 %v3378_v61  ;;  %593 = vmatprep.subr.bf16.mxu1 %v3380_v62  ;;  %v3367_v61 = vcombine.low %v143_v48, %v147_v49  ;;  %v162_v62 = vld [vmem:[#allocation5 + $0x1f0] sm:$0xff]  ;;  %v3807_v17 = vld [vmem:[#allocation8 + $0x220] ss:$16 sps:$4 sm:$0xff]   ;;  %v3821_v23 = vld [vmem:[#allocation8 + $0x264] ss:$16 sps:$4 sm:$0xff]  }
  0x7a   :  { %v3382_v4 = vcombine.high %v158_v60, %v162_v62  ;;  %v3813_v21 = vld [vmem:[#allocation8 + $0x240] ss:$16 sps:$4 sm:$0xff]   ;;  %v3833_v30 = vld [vmem:[#allocation8 + $0x2a4] ss:$16 sps:$4 sm:$0xff]  }
  0x7b   :  { %v3819_v24 = vld [vmem:[#allocation8 + $0x260] ss:$16 sps:$4 sm:$0xff]   ;;  %v3836_v33 = vld [vmem:[#allocation8 + $0xc4] ss:$16 sps:$4 sm:$0xff]  }
  0x7c   :  { %541 = vmatpush1.bf16.msra.mxu0 %v3377_v5  ;;  %594 = vmatpush1.bf16.msra.mxu1 %v3379_v7  ;;  %v3375_v5 = vcombine.low %v151_v56, %v155_v57  ;;  %v3803_v7 = vld [vmem:[#allocation8 + $0x204] ss:$16 sps:$4 sm:$0xff]   ;;  %v3825_v27 = vld [vmem:[#allocation8 + $0x280] ss:$16 sps:$4 sm:$0xff]  }
  0x7d   :  { %632 = vmatprep.subr.bf16.mxu0 %v3326_v8  ;;  %685 = vmatprep.subr.bf16.mxu1 %v3328_v10  ;;  %v3381_v8 = vcombine.low %v158_v60, %v162_v62  ;;  %v3383_v10 = vcombine.low %v159_v1, %v163_v2  ;;  %v3831_v32 = vld [vmem:[#allocation8 + $0x2a0] ss:$16 sps:$4 sm:$0xff]   ;;  %v3842_v36 = vld [vmem:[#allocation8 + $0xe4] ss:$16 sps:$4 sm:$0xff]  }
  0x7e   :  { %v3840_v38 = vld [vmem:[#allocation8 + $0xe0] ss:$16 sps:$4 sm:$0xff]   ;;  %v3848_v40 = vld [vmem:[#allocation8 + $0x104] ss:$16 sps:$4 sm:$0xff]  }
  0x7f   :  { %559 = vmatmul.mubr.bf16.vlgmr.msra.gmra.mrb[0].mxu0 %v4542_v11  ;;  %612 = vmatmul.mubr.bf16.vlgmr.msra.gmra.mrb[0].mxu1 %v4542_v11  ;;  %v3851_v41 = vld [vmem:[#allocation8 + $0x304] ss:$16 sps:$4 sm:$0xff]   ;;  %v3852_v46 = vld [vmem:[#allocation8 + $0x120] ss:$16 sps:$4 sm:$0xff]  }
  0x80   :  { %568 = vmatprep.mubr.bf16.mxu0 %v4429_v0  ;;  %633 = vmatpush1.bf16.msra.mxu0 %v3325_v15  ;;  %v3809_v15 = vld [vmem:[#allocation8 + $0x224] ss:$16 sps:$4 sm:$0xff]   ;;  %v3864_v54 = vld [vmem:[#allocation8 + $0x160] ss:$16 sps:$4 sm:$0xff]  }
  0x81   :  { %621 = vmatprep.mubr.bf16.mxu1 %v4429_v0  ;;  %634 = vmatprep.subr.bf16.mxu0 %v3334_v18  ;;  %v3812_v18 = vld [vmem:[#allocation8 + $0x44] ss:$16 sps:$4 sm:$0xff]   ;;  %v3876_v62 = vld [vmem:[#allocation8 + $0x1a0] ss:$16 sps:$4 sm:$0xff]  }
  0x82   :  { %686 = vmatpush1.bf16.msra.mxu1 %v3327_v20  ;;  %v3810_v20 = vld [vmem:[#allocation8 + $0x40] ss:$16 sps:$4 sm:$0xff]   ;;  %v3854_v44 = vld [vmem:[#allocation8 + $0x124] ss:$16 sps:$4 sm:$0xff]  }
  0x83   :  { %687 = vmatprep.subr.bf16.mxu1 %v3336_v22  ;;  %v3818_v22 = vld [vmem:[#allocation8 + $0x64] ss:$16 sps:$4 sm:$0xff]   ;;  %v3882_v2 = vld [vmem:[#allocation8 + $0x1c0] ss:$16 sps:$4 sm:$0xff]  }
  0x84   :  { %635 = vmatpush1.bf16.msra.mxu0 %v3333_v25  ;;  %v3827_v25 = vld [vmem:[#allocation8 + $0x284] ss:$16 sps:$4 sm:$0xff]  }
  0x85   :  { %636 = vmatprep.subr.bf16.mxu0 %v3342_v26  ;;  %v3822_v26 = vld [vmem:[#allocation8 + $0x80] ss:$16 sps:$4 sm:$0xff]   ;;  %v3860_v48 = vld [vmem:[#allocation8 + $0x144] ss:$16 sps:$4 sm:$0xff]  }
  0x86   :  { %688 = vmatpush1.bf16.msra.mxu1 %v3335_v28  ;;  %v3830_v28 = vld [vmem:[#allocation8 + $0xa4] ss:$16 sps:$4 sm:$0xff]  }
  0x87   :  { %569 = vmatmul.mubr.bf16.gmra.mrb[4].mxu0 %v4548_v29  ;;  %689 = vmatprep.subr.bf16.mxu1 %v3344_v31  ;;  %v3828_v31 = vld [vmem:[#allocation8 + $0xa0] ss:$16 sps:$4 sm:$0xff]   ;;  %v3863_v49 = vld [vmem:[#allocation8 + $0x344] ss:$16 sps:$4 sm:$0xff]  }
  0x88   :  { %622 = vmatmul.mubr.bf16.gmra.mrb[4].mxu1 %v4548_v29  ;;  %664 = vmatprep.mubr.bf16.mxu0 %v4429_v0  ;;  %v3866_v52 = vld [vmem:[#allocation8 + $0x164] ss:$16 sps:$4 sm:$0xff]  }
  0x89   :  { %637 = vmatpush1.bf16.msra.mxu0 %v3341_v34  ;;  %717 = vmatprep.mubr.bf16.mxu1 %v4429_v0  ;;  %v3834_v34 = vld [vmem:[#allocation8 + $0xc0] ss:$16 sps:$4 sm:$0xff]   ;;  %v3872_v56 = vld [vmem:[#allocation8 + $0x184] ss:$16 sps:$4 sm:$0xff]  }
  0x8a   :  { %638 = vmatprep.subr.bf16.mxu0 %v3350_v35  ;;  %690 = vmatpush1.bf16.msra.mxu1 %v3343_v37  ;;  %v3837_v35 = vld [vmem:[#allocation8 + $0x2c0] ss:$16 sps:$4 sm:$0xff]   ;;  %v3845_v37 = vld [vmem:[#allocation8 + $0x2e4] ss:$16 sps:$4 sm:$0xff]  }
  0x8b   :  { %691 = vmatprep.subr.bf16.mxu1 %v3352_v39  ;;  %v3843_v39 = vld [vmem:[#allocation8 + $0x2e0] ss:$16 sps:$4 sm:$0xff]   ;;  %v3875_v57 = vld [vmem:[#allocation8 + $0x384] ss:$16 sps:$4 sm:$0xff]  }
  0x8c   :  { %v3878_v60 = vld [vmem:[#allocation8 + $0x1a4] ss:$16 sps:$4 sm:$0xff]  }
  0x8d   :  { %639 = vmatpush1.bf16.msra.mxu0 %v3349_v42  ;;  %v3846_v42 = vld [vmem:[#allocation8 + $0x100] ss:$16 sps:$4 sm:$0xff]   ;;  %v3884_v1 = vld [vmem:[#allocation8 + $0x1c4] ss:$16 sps:$4 sm:$0xff]  }
  0x8e   :  { %640 = vmatprep.subr.bf16.mxu0 %v3358_v43  ;;  %692 = vmatpush1.bf16.msra.mxu1 %v3351_v45  ;;  %v3849_v43 = vld [vmem:[#allocation8 + $0x300] ss:$16 sps:$4 sm:$0xff]   ;;  %v3857_v45 = vld [vmem:[#allocation8 + $0x324] ss:$16 sps:$4 sm:$0xff]  }
  0x8f   :  { %693 = vmatprep.subr.bf16.mxu1 %v3360_v47  ;;  %v3855_v47 = vld [vmem:[#allocation8 + $0x320] ss:$16 sps:$4 sm:$0xff]  }
  0x91   :  { %641 = vmatpush1.bf16.msra.mxu0 %v3357_v50  ;;  %v3858_v50 = vld [vmem:[#allocation8 + $0x140] ss:$16 sps:$4 sm:$0xff]  }
  0x92   :  { %642 = vmatprep.subr.bf16.mxu0 %v3366_v51  ;;  %694 = vmatpush1.bf16.msra.mxu1 %v3359_v53  ;;  %v3861_v51 = vld [vmem:[#allocation8 + $0x340] ss:$16 sps:$4 sm:$0xff]   ;;  %v3869_v53 = vld [vmem:[#allocation8 + $0x364] ss:$16 sps:$4 sm:$0xff]  }
  0x93   :  { %695 = vmatprep.subr.bf16.mxu1 %v3368_v55  ;;  %v3867_v55 = vld [vmem:[#allocation8 + $0x360] ss:$16 sps:$4 sm:$0xff]  }
  0x95   :  { %643 = vmatpush1.bf16.msra.mxu0 %v3365_v58  ;;  %v3870_v58 = vld [vmem:[#allocation8 + $0x180] ss:$16 sps:$4 sm:$0xff]  }
  0x96   :  { %644 = vmatprep.subr.bf16.mxu0 %v3374_v59  ;;  %696 = vmatpush1.bf16.msra.mxu1 %v3367_v61  ;;  %v3873_v59 = vld [vmem:[#allocation8 + $0x380] ss:$16 sps:$4 sm:$0xff]   ;;  %v3881_v61 = vld [vmem:[#allocation8 + $0x3a4] ss:$16 sps:$4 sm:$0xff]  }
  0x97   :  { %697 = vmatprep.subr.bf16.mxu1 %v3376_v63  ;;  %v3879_v63 = vld [vmem:[#allocation8 + $0x3a0] ss:$16 sps:$4 sm:$0xff]  }
  0x99   :  { %645 = vmatpush1.bf16.msra.mxu0 %v3373_v3  ;;  %v3887_v3 = vld [vmem:[#allocation8 + $0x3c4] ss:$16 sps:$4 sm:$0xff]  }
  0x9a   :  { %646 = vmatprep.subr.bf16.mxu0 %v3382_v4  ;;  %698 = vmatpush1.bf16.msra.mxu1 %v3375_v5  ;;  %v3885_v4 = vld [vmem:[#allocation8 + $0x3c0] ss:$16 sps:$4 sm:$0xff]   ;;  %v3890_v5 = vld [vmem:[#allocation8 + $0x1e4] ss:$16 sps:$4 sm:$0xff]  }
  0x9b   :  { %699 = vmatprep.subr.bf16.mxu1 %v3384_v6  ;;  %v3888_v6 = vld [vmem:[#allocation8 + $0x1e0] ss:$16 sps:$4 sm:$0xff]  }
  0x9d   :  { %647 = vmatpush1.bf16.msra.mxu0 %v3381_v8  ;;  %v3891_v8 = vld [vmem:[#allocation8 + $0x3e0] ss:$16 sps:$4 sm:$0xff]  }
  0x9e   :  { %700 = vmatpush1.bf16.msra.mxu1 %v3383_v10  ;;  %2397 = vmatprep.subr.bf16.mxu0 %v3803_v7  ;;  %v3893_v7 = vld [vmem:[#allocation8 + $0x3e4] ss:$16 sps:$4 sm:$0xff]  }
  0x9f   :  { %2344 = vmatprep.subr.bf16.mxu1 %v3800_v9  ;;  %v3899_v9 = vld [vmem:[#allocation8 + $0xc] ss:$16 sps:$4 sm:$0xff]   ;;  %v3896_v10 = vld [vmem:[#allocation8 + $0x404] ss:$16 sps:$4 sm:$0xff]  }
  0xa0   :  { %665 = vmatmul.mubr.bf16.vlgmr.msra.gmra.mrb[8].mxu0 %v4542_v11 }
  0xa1   :  { %674 = vmatprep.mubr.bf16.mxu0 %v4429_v0  ;;  %718 = vmatmul.mubr.bf16.vlgmr.msra.gmra.mrb[8].mxu1 %v4542_v11  ;;  %v3816_v11 = vld [vmem:[#allocation8 + $0x60] ss:$16 sps:$4 sm:$0xff]  }
  0xa2   :  { %727 = vmatprep.mubr.bf16.mxu1 %v4429_v0  ;;  %2345 = vmatpush1.bf16.msra.mxu1 %v3798_v12  ;;  %v3824_v0 = vld [vmem:[#allocation8 + $0x84] ss:$16 sps:$4 sm:$0xff]   ;;  %v166_v12 = vlaneseq }
  0xa3   :  { %2398 = vmatpush1.bf16.msra.mxu0 %v3801_v13  ;;  %2346 = vmatprep.subr.bf16.mxu1 %v3806_v14 }
  0xa4   :  { %2399 = vmatprep.subr.bf16.mxu0 %v3809_v15  ;;  %v4560_v13 = vshrl.u32 %v166_v12, 7  ;;  %v4565_v15 = vld [vmem:[#allocation7] sm:$0xff] }
  0xa5   :  { %v3911_v12 = vld [vmem:[#allocation8 + $0x4c] ss:$16 sps:$4 sm:$0xff]  }
  0xa6   :  { %2347 = vmatpush1.bf16.msra.mxu1 %v3804_v16  ;;  %v4563_v14 = vsub.s32 0, %v4560_v13  ;;  %v176_v16 = vsub.s32 2, %v4560_v13 }
  0xa7   :  { %2400 = vmatpush1.bf16.msra.mxu0 %v3807_v17  ;;  %2348 = vmatprep.subr.bf16.mxu1 %v3812_v18  ;;  %v4569_v17 = vsub.s32 1, %v4560_v13  ;;  %v180_v18 = vsub.s32 3, %v4560_v13 }
  0xa8   :  { %675 = vmatmul.mubr.bf16.gmra.mrb[12].mxu0 %v4548_v29  ;;  %2401 = vmatprep.subr.bf16.mxu0 %v3815_v19  ;;  %v169_v19 = vrot.slane %v4565_v15, %v4563_v14 }
  0xa9   :  { %728 = vmatmul.mubr.bf16.gmra.mrb[12].mxu1 %v4548_v29  ;;  %v3839_v29 = vld [vmem:[#allocation8 + $0x2c4] ss:$16 sps:$4 sm:$0xff]  }
  0xaa   :  { %2349 = vmatpush1.bf16.msra.mxu1 %v3810_v20  ;;  %v177_v20 = vrot.slane %v4565_v15, %v176_v16 }
  0xab   :  { %2402 = vmatpush1.bf16.msra.mxu0 %v3813_v21  ;;  %2350 = vmatprep.subr.bf16.mxu1 %v3818_v22  ;;  %v173_v21 = vrot.slane %v4565_v15, %v4569_v17  ;;  %v4582_v22 = vrot.slane %v4565_v15, %v180_v18 }
  0xac   :  { %2403 = vmatprep.subr.bf16.mxu0 %v3821_v23 }
  0xae   :  { %2351 = vmatpush1.bf16.msra.mxu1 %v3816_v11 }
  0xaf   :  { %2404 = vmatpush1.bf16.msra.mxu0 %v3819_v24  ;;  %2352 = vmatprep.subr.bf16.mxu1 %v3824_v0 }
  0xb0   :  { %2405 = vmatprep.subr.bf16.mxu0 %v3827_v25 }
  0xb2   :  { %2353 = vmatpush1.bf16.msra.mxu1 %v3822_v26 }
  0xb3   :  { %2406 = vmatpush1.bf16.msra.mxu0 %v3825_v27  ;;  %2354 = vmatprep.subr.bf16.mxu1 %v3830_v28 }
  0xb4   :  { %2407 = vmatprep.subr.bf16.mxu0 %v3833_v30 }
  0xb6   :  { %2355 = vmatpush1.bf16.msra.mxu1 %v3828_v31 }
  0xb7   :  { %2408 = vmatpush1.bf16.msra.mxu0 %v3831_v32  ;;  %2356 = vmatprep.subr.bf16.mxu1 %v3836_v33 }
  0xb8   :  { %2409 = vmatprep.subr.bf16.mxu0 %v3839_v29 }
  0xba   :  { %2357 = vmatpush1.bf16.msra.mxu1 %v3834_v34 }
  0xbb   :  { %2410 = vmatpush1.bf16.msra.mxu0 %v3837_v35  ;;  %2358 = vmatprep.subr.bf16.mxu1 %v3842_v36 }
  0xbc   :  { %2411 = vmatprep.subr.bf16.mxu0 %v3845_v37 }
  0xbe   :  { %2359 = vmatpush1.bf16.msra.mxu1 %v3840_v38 }
  0xbf   :  { %2412 = vmatpush1.bf16.msra.mxu0 %v3843_v39  ;;  %2360 = vmatprep.subr.bf16.mxu1 %v3848_v40 }
  0xc0   :  { %2413 = vmatprep.subr.bf16.mxu0 %v3851_v41 }
  0xc2   :  { %2361 = vmatpush1.bf16.msra.mxu1 %v3846_v42 }
  0xc3   :  { %2414 = vmatpush1.bf16.msra.mxu0 %v3849_v43  ;;  %2362 = vmatprep.subr.bf16.mxu1 %v3854_v44 }
  0xc4   :  { %2415 = vmatprep.subr.bf16.mxu0 %v3857_v45 }
  0xc6   :  { %2363 = vmatpush1.bf16.msra.mxu1 %v3852_v46 }
  0xc7   :  { %2416 = vmatpush1.bf16.msra.mxu0 %v3855_v47  ;;  %2364 = vmatprep.subr.bf16.mxu1 %v3860_v48 }
  0xc8   :  { %2417 = vmatprep.subr.bf16.mxu0 %v3863_v49  ;;  %v3897_v49 = vld [vmem:[#allocation8 + $0x8] ss:$16 sps:$4 sm:$0xff]  }
  0xca   :  { %2365 = vmatpush1.bf16.msra.mxu1 %v3858_v50 }
  0xcb   :  { %2418 = vmatpush1.bf16.msra.mxu0 %v3861_v51  ;;  %2366 = vmatprep.subr.bf16.mxu1 %v3866_v52 }
  0xcc   :  { %2419 = vmatprep.subr.bf16.mxu0 %v3869_v53  ;;  %v3894_v53 = vld [vmem:[#allocation8 + $0x400] ss:$16 sps:$4 sm:$0xff]  }
  0xce   :  { %2367 = vmatpush1.bf16.msra.mxu1 %v3864_v54  ;;  %v3905_v54 = vld [vmem:[#allocation8 + $0x2c] ss:$16 sps:$4 sm:$0xff]  }
  0xcf   :  { %2420 = vmatpush1.bf16.msra.mxu0 %v3867_v55  ;;  %2368 = vmatprep.subr.bf16.mxu1 %v3872_v56 }
  0xd0   :  { %2421 = vmatprep.subr.bf16.mxu0 %v3875_v57 }
  0xd2   :  { %2369 = vmatpush1.bf16.msra.mxu1 %v3870_v58  ;;  %v3902_v58 = vld [vmem:[#allocation8 + $0x424] ss:$16 sps:$4 sm:$0xff]  }
  0xd3   :  { %2422 = vmatpush1.bf16.msra.mxu0 %v3873_v59  ;;  %2370 = vmatprep.subr.bf16.mxu1 %v3878_v60 }
  0xd4   :  { %2423 = vmatprep.subr.bf16.mxu0 %v3881_v61 }
  0xd6   :  { %2371 = vmatpush1.bf16.msra.mxu1 %v3876_v62 }
  0xd7   :  { %2424 = vmatpush1.bf16.msra.mxu0 %v3879_v63  ;;  %2372 = vmatprep.subr.bf16.mxu1 %v3884_v1 }
  0xd8   :  { %2425 = vmatprep.subr.bf16.mxu0 %v3887_v3 }
  0xda   :  { %2373 = vmatpush1.bf16.msra.mxu1 %v3882_v2 }
  0xdb   :  { %2426 = vmatpush1.bf16.msra.mxu0 %v3885_v4  ;;  %2374 = vmatprep.subr.bf16.mxu1 %v3890_v5  ;;  %v3903_v5 = vld [vmem:[#allocation8 + $0x28] ss:$16 sps:$4 sm:$0xff]  }
  0xdc   :  { %2427 = vmatprep.subr.bf16.mxu0 %v3893_v7 }
  0xde   :  { %2375 = vmatpush1.bf16.msra.mxu1 %v3888_v6 }
  0xdf   :  { %2428 = vmatpush1.bf16.msra.mxu0 %v3891_v8  ;;  %2556 = vmatprep.subr.bf16.mxu1 %v3899_v9 }
  0xe0   :  { %2450 = vmatprep.subr.bf16.mxu0 %v3896_v10  ;;  %v3900_v10 = vld [vmem:[#allocation8 + $0x420] ss:$16 sps:$4 sm:$0xff]  }
 0x152   :  { %v560_v23 = vpop.f32.mrb[0].mxu0  ;;  %v613_v24 = vpop.f32.mrb[0].mxu1 }
 0x153   :  { %v561_v11 = vadd.f32 %v560_v23, %v169_v19  ;;  %v562_v0 = vpop.f32.mrb[1].mxu0  ;;  %v614_v25 = vadd.f32 %v613_v24, %v177_v20  ;;  %v615_v27 = vpop.f32.mrb[1].mxu1  ;;  %v3908_v24 = vld [vmem:[#allocation8 + $0x444] ss:$16 sps:$4 sm:$0xff]  }
 0x154   :  { %v563_v26 = vadd.f32 %v562_v0, %v173_v21  ;;  %v564_v28 = vpop.f32.mrb[2].mxu0  ;;  %v616_v30 = vadd.f32 %v615_v27, %v4582_v22  ;;  %v617_v32 = vpop.f32.mrb[2].mxu1 }
 0x155   :  { %v565_v31 = vadd.f32 %v564_v28, %v169_v19  ;;  %v566_v33 = vpop.f32.mrb[3].mxu0  ;;  %v740_v29 = vmax.f32 %v614_v25, 0.0  ;;  %v618_v34 = vadd.f32 %v617_v32, %v177_v20  ;;  %v619_v36 = vpop.f32.mrb[3].mxu1  ;;  %v738_v37 = vmax.f32 %v561_v11, 0.0  ;;  %v3906_v28 = vld [vmem:[#allocation8 + $0x440] ss:$16 sps:$4 sm:$0xff]  }
 0x156   :  { %v567_v35 = vadd.f32 %v566_v33, %v173_v21  ;;  %v741_v38 = vmax.f32 %v616_v30, 0.0  ;;  %v620_v40 = vadd.f32 %v619_v36, %v4582_v22  ;;  %v739_v41 = vmax.f32 %v563_v26, 0.0  ;;  %v3917_v30 = vld [vmem:[#allocation8 + $0x6c] ss:$16 sps:$4 sm:$0xff]   ;;  %v3915_v32 = vld [vmem:[#allocation8 + $0x68] ss:$16 sps:$4 sm:$0xff]  }
 0x157   :  { %v746_v39 = vmax.f32 %v565_v31, 0.0  ;;  %v748_v42 = vmax.f32 %v618_v34, 0.0  ;;  %v3912_v33 = vld [vmem:[#allocation8 + $0x460] ss:$16 sps:$4 sm:$0xff]   ;;  %v3920_v34 = vld [vmem:[#allocation8 + $0x484] ss:$16 sps:$4 sm:$0xff]  }
 0x158   :  { %v747_v43 = vmax.f32 %v567_v35, 0.0  ;;  %v749_v45 = vmax.f32 %v620_v40, 0.0  ;;  %v3921_v35 = vld [vmem:[#allocation8 + $0x88] ss:$16 sps:$4 sm:$0xff]   ;;  %v3918_v36 = vld [vmem:[#allocation8 + $0x480] ss:$16 sps:$4 sm:$0xff]  }
 0x159   :  { %v4586_v44 = vpack.c.bf16 %v746_v39, %v738_v37  ;;  %v4588_v46 = vpack.c.bf16 %v748_v42, %v740_v29  ;;  %v3923_v29 = vld [vmem:[#allocation8 + $0x8c] ss:$16 sps:$4 sm:$0xff]   ;;  %v184_v39 = vsub.s32 4, %v4560_v13  ;;  %v188_v40 = vsub.s32 5, %v4560_v13  ;;  %v3927_v42 = vld [vmem:[#allocation8 + $0xa8] ss:$16 sps:$4 sm:$0xff]  }
 0x15a   :  { %v771_v47 = vpack.c.bf16 %v747_v43, %v739_v41  ;;  %v570_v48 = vpop.f32.mrb[4].mxu0  ;;  %v4590_v50 = vpack.c.bf16 %v749_v45, %v741_v38  ;;  %v3929_v37 = vld [vmem:[#allocation8 + $0xac] ss:$16 sps:$4 sm:$0xff]   ;;  %v3926_v38 = vld [vmem:[#allocation8 + $0x4a4] ss:$16 sps:$4 sm:$0xff]   ;;  %v192_v41 = vsub.s32 6, %v4560_v13 }
 0x15b   :  { %v571_v51 = vadd.f32 %v570_v48, %v169_v19  ;;  %v572_v52 = vpop.f32.mrb[5].mxu0  ;;  %v623_v55 = vpop.f32.mrb[4].mxu1  ;;  %v196_v43 = vsub.s32 7, %v4560_v13  ;;  %v3924_v45 = vld [vmem:[#allocation8 + $0x4a0] ss:$16 sps:$4 sm:$0xff]  }
 0x15c   :  { %v573_v56 = vadd.f32 %v572_v52, %v173_v21  ;;  %v574_v57 = vpop.f32.mrb[6].mxu0  ;;  %2376 = vmatprep.mubr.bf16.mxu1 %v771_v47  ;;  %v624_v59 = vadd.f32 %v623_v55, %v177_v20  ;;  %v625_v60 = vpop.f32.mrb[5].mxu1  ;;  %2429 = vmatprep.mubr.bf16.mxu0 %v4590_v50  ;;  %v3932_v48 = vld [vmem:[#allocation8 + $0x4c4] ss:$16 sps:$4 sm:$0xff]   ;;  %v4620_v52 = vrot.slane %v4565_v15, %v192_v41  ;;  %v3930_v55 = vld [vmem:[#allocation8 + $0x4c0] ss:$16 sps:$4 sm:$0xff]  }
 0x15d   :  { %v754_v61 = vmax.f32 %v571_v51, 0.0  ;;  %v575_v62 = vadd.f32 %v574_v57, %v169_v19  ;;  %v576_v63 = vpop.f32.mrb[7].mxu0  ;;  %2377 = vmatmul.mubr.bf16.vlgmr.msra.gmra.mrb[16].mxu1 %v4586_v44  ;;  %v626_v1 = vadd.f32 %v625_v60, %v4582_v22  ;;  %v627_v2 = vpop.f32.mrb[6].mxu1  ;;  %2430 = vmatmul.mubr.bf16.vlgmr.msra.gmra.mrb[16].mxu0 %v4588_v46  ;;  %v4617_v51 = vrot.slane %v4565_v15, %v188_v40 }
 0x15e   :  { %v755_v3 = vmax.f32 %v573_v56, 0.0  ;;  %v577_v4 = vadd.f32 %v576_v63, %v173_v21  ;;  %2557 = vmatpush1.bf16.msra.mxu1 %v3897_v49  ;;  %v756_v6 = vmax.f32 %v624_v59, 0.0  ;;  %v628_v7 = vadd.f32 %v627_v2, %v177_v20  ;;  %v629_v8 = vpop.f32.mrb[7].mxu1  ;;  %2451 = vmatpush1.bf16.msra.mxu0 %v3894_v53  ;;  %v3909_v20 = vld [vmem:[#allocation8 + $0x48] ss:$16 sps:$4 sm:$0xff]  }
 0x15f   :  { %v762_v9 = vmax.f32 %v575_v62, 0.0  ;;  %2558 = vmatprep.subr.bf16.mxu1 %v3905_v54  ;;  %v757_v19 = vmax.f32 %v626_v1, 0.0  ;;  %v630_v23 = vadd.f32 %v629_v8, %v4582_v22  ;;  %2452 = vmatprep.subr.bf16.mxu0 %v3902_v58  ;;  %v3914_v22 = vld [vmem:[#allocation8 + $0x464] ss:$16 sps:$4 sm:$0xff]   ;;  %v4614_v49 = vrot.slane %v4565_v15, %v184_v39  ;;  %v3933_v53 = vld [vmem:[#allocation8 + $0xc8] ss:$16 sps:$4 sm:$0xff]  }
 0x160   :  { %v763_v11 = vmax.f32 %v577_v4, 0.0  ;;  %v764_v0 = vmax.f32 %v628_v7, 0.0  ;;  %v4623_v54 = vrot.slane %v4565_v15, %v196_v43  ;;  %v3941_v56 = vld [vmem:[#allocation8 + $0xec] ss:$16 sps:$4 sm:$0xff]   ;;  %v3938_v58 = vld [vmem:[#allocation8 + $0x4e4] ss:$16 sps:$4 sm:$0xff]  }
 0x161   :  { %v4597_v21 = vpack.c.bf16 %v762_v9, %v754_v61  ;;  %v765_v25 = vmax.f32 %v630_v23, 0.0  ;;  %v3936_v62 = vld [vmem:[#allocation8 + $0x4e0] ss:$16 sps:$4 sm:$0xff]   ;;  %v3939_v15 = vld [vmem:[#allocation8 + $0xe8] ss:$16 sps:$4 sm:$0xff]  }
 0x162   :  { %v4599_v26 = vpack.c.bf16 %v763_v11, %v755_v3  ;;  %2559 = vmatpush1.bf16.msra.mxu1 %v3903_v5  ;;  %v4601_v27 = vpack.c.bf16 %v764_v0, %v756_v6  ;;  %2453 = vmatpush1.bf16.msra.mxu0 %v3900_v10  ;;  %v3947_v9 = vld [vmem:[#allocation8 + $0x10c] ss:$16 sps:$4 sm:$0xff]   ;;  %v3948_v43 = vld [vmem:[#allocation8 + $0x520] ss:$16 sps:$4 sm:$0xff]  }
 0x163   :  { %2560 = vmatprep.subr.bf16.mxu1 %v3911_v12  ;;  %v4603_v31 = vpack.c.bf16 %v765_v25, %v757_v19  ;;  %2454 = vmatprep.subr.bf16.mxu0 %v3908_v24  ;;  %v3944_v24 = vld [vmem:[#allocation8 + $0x504] ss:$16 sps:$4 sm:$0xff]  }
 0x164   :  { %2386 = vmatprep.mubr.bf16.mxu1 %v4599_v26 }
 0x165   :  { %2387 = vmatmul.mubr.bf16.gmra.mrb[20].mxu1 %v4597_v21  ;;  %2439 = vmatprep.mubr.bf16.mxu0 %v4603_v31 }
 0x166   :  { %2561 = vmatpush1.bf16.msra.mxu1 %v3909_v20  ;;  %2588 = vmatprep.mubr.bf16.mxu1 %v771_v47  ;;  %v3935_v47 = vld [vmem:[#allocation8 + $0xcc] ss:$16 sps:$4 sm:$0xff]  }
 0x167   :  { %2455 = vmatpush1.bf16.msra.mxu0 %v3906_v28  ;;  %2562 = vmatprep.subr.bf16.mxu1 %v3917_v30 }
 0x168   :  { %2456 = vmatprep.subr.bf16.mxu0 %v3914_v22  ;;  %2440 = vmatmul.mubr.bf16.gmra.mrb[20].mxu0 %v4601_v27  ;;  %v3945_v22 = vld [vmem:[#allocation8 + $0x108] ss:$16 sps:$4 sm:$0xff]  }
 0x16a   :  { %2563 = vmatpush1.bf16.msra.mxu1 %v3915_v32 }
 0x16b   :  { %2457 = vmatpush1.bf16.msra.mxu0 %v3912_v33  ;;  %2564 = vmatprep.subr.bf16.mxu1 %v3923_v29  ;;  %v3942_v29 = vld [vmem:[#allocation8 + $0x500] ss:$16 sps:$4 sm:$0xff]  }
 0x16c   :  { %2458 = vmatprep.subr.bf16.mxu0 %v3920_v34  ;;  %v3953_v34 = vld [vmem:[#allocation8 + $0x12c] ss:$16 sps:$4 sm:$0xff]  }
 0x16e   :  { %2565 = vmatpush1.bf16.msra.mxu1 %v3921_v35 }
 0x16f   :  { %2459 = vmatpush1.bf16.msra.mxu0 %v3918_v36  ;;  %2566 = vmatprep.subr.bf16.mxu1 %v3929_v37 }
 0x170   :  { %2460 = vmatprep.subr.bf16.mxu0 %v3926_v38  ;;  %v3950_v38 = vld [vmem:[#allocation8 + $0x524] ss:$16 sps:$4 sm:$0xff]  }
 0x172   :  { %2567 = vmatpush1.bf16.msra.mxu1 %v3927_v42 }
 0x173   :  { %2461 = vmatpush1.bf16.msra.mxu0 %v3924_v45  ;;  %2568 = vmatprep.subr.bf16.mxu1 %v3935_v47  ;;  %v666_v57 = vpop.f32.mrb[8].mxu0 }
 0x174   :  { %2462 = vmatprep.subr.bf16.mxu0 %v3932_v48  ;;  %v667_v59 = vadd.f32 %v666_v57, %v4614_v49  ;;  %v668_v60 = vpop.f32.mrb[9].mxu0  ;;  %v719_v61 = vpop.f32.mrb[8].mxu1 }
 0x175   :  { %v669_v63 = vadd.f32 %v668_v60, %v4617_v51  ;;  %v670_v1 = vpop.f32.mrb[10].mxu0  ;;  %v720_v2 = vadd.f32 %v719_v61, %v4620_v52  ;;  %v721_v3 = vpop.f32.mrb[9].mxu1  ;;  %v3959_v61 = vld [vmem:[#allocation8 + $0x14c] ss:$16 sps:$4 sm:$0xff]  }
 0x176   :  { %2569 = vmatpush1.bf16.msra.mxu1 %v3933_v53  ;;  %v742_v4 = vmax.f32 %v667_v59, 0.0  ;;  %v671_v5 = vadd.f32 %v670_v1, %v4614_v49  ;;  %v672_v6 = vpop.f32.mrb[11].mxu0  ;;  %v722_v7 = vadd.f32 %v721_v3, %v4623_v54  ;;  %v723_v8 = vpop.f32.mrb[10].mxu1 }
 0x177   :  { %2463 = vmatpush1.bf16.msra.mxu0 %v3930_v55  ;;  %2570 = vmatprep.subr.bf16.mxu1 %v3941_v56  ;;  %v743_v10 = vmax.f32 %v669_v63, 0.0  ;;  %v673_v12 = vadd.f32 %v672_v6, %v4617_v51  ;;  %v744_v19 = vmax.f32 %v720_v2, 0.0  ;;  %v724_v23 = vadd.f32 %v723_v8, %v4620_v52  ;;  %v725_v11 = vpop.f32.mrb[11].mxu1  ;;  %v3951_v55 = vld [vmem:[#allocation8 + $0x128] ss:$16 sps:$4 sm:$0xff]  }
 0x178   :  { %2464 = vmatprep.subr.bf16.mxu0 %v3938_v58  ;;  %v750_v0 = vmax.f32 %v671_v5, 0.0  ;;  %v745_v25 = vmax.f32 %v722_v7, 0.0  ;;  %v726_v20 = vadd.f32 %v725_v11, %v4623_v54  ;;  %v3957_v8 = vld [vmem:[#allocation8 + $0x148] ss:$16 sps:$4 sm:$0xff]  }
 0x179   :  { %v751_v28 = vmax.f32 %v673_v12, 0.0  ;;  %v752_v30 = vmax.f32 %v724_v23, 0.0  ;;  %v3954_v12 = vld [vmem:[#allocation8 + $0x540] ss:$16 sps:$4 sm:$0xff]   ;;  %v3962_v23 = vld [vmem:[#allocation8 + $0x564] ss:$16 sps:$4 sm:$0xff]  }
 0x17a   :  { %2571 = vmatpush1.bf16.msra.mxu1 %v3939_v15  ;;  %v4633_v32 = vpack.c.bf16 %v750_v0, %v742_v4  ;;  %v753_v33 = vmax.f32 %v726_v20, 0.0  ;;  %v3956_v15 = vld [vmem:[#allocation8 + $0x544] ss:$16 sps:$4 sm:$0xff]   ;;  %v3971_v0 = vld [vmem:[#allocation8 + $0x18c] ss:$16 sps:$4 sm:$0xff]  }
 0x17b   :  { %2465 = vmatpush1.bf16.msra.mxu0 %v3936_v62  ;;  %2572 = vmatprep.subr.bf16.mxu1 %v3947_v9  ;;  %v4635_v35 = vpack.c.bf16 %v751_v28, %v743_v10  ;;  %v676_v36 = vpop.f32.mrb[12].mxu0  ;;  %v4637_v37 = vpack.c.bf16 %v752_v30, %v744_v19  ;;  %v3969_v20 = vld [vmem:[#allocation8 + $0x188] ss:$16 sps:$4 sm:$0xff]   ;;  %v3966_v28 = vld [vmem:[#allocation8 + $0x580] ss:$16 sps:$4 sm:$0xff]  }
 0x17c   :  { %2466 = vmatprep.subr.bf16.mxu0 %v3944_v24  ;;  %v677_v39 = vadd.f32 %v676_v36, %v4614_v49  ;;  %v678_v40 = vpop.f32.mrb[13].mxu0  ;;  %v4640_v41 = vpack.c.bf16 %v753_v33, %v745_v25  ;;  %v729_v42 = vpop.f32.mrb[12].mxu1  ;;  %v3960_v24 = vld [vmem:[#allocation8 + $0x560] ss:$16 sps:$4 sm:$0xff]   ;;  %v3968_v25 = vld [vmem:[#allocation8 + $0x584] ss:$16 sps:$4 sm:$0xff]  }
 0x17d   :  { %2482 = vmatprep.mubr.bf16.mxu0 %v4635_v35  ;;  %v679_v45 = vadd.f32 %v678_v40, %v4617_v51  ;;  %v680_v47 = vpop.f32.mrb[14].mxu0  ;;  %v730_v48 = vadd.f32 %v729_v42, %v4620_v52  ;;  %v731_v53 = vpop.f32.mrb[13].mxu1  ;;  %v3977_v30 = vld [vmem:[#allocation8 + $0x1ac] ss:$16 sps:$4 sm:$0xff]   ;;  %v3975_v33 = vld [vmem:[#allocation8 + $0x1a8] ss:$16 sps:$4 sm:$0xff]  }
 0x17e   :  { %2573 = vmatpush1.bf16.msra.mxu1 %v3945_v22  ;;  %v758_v56 = vmax.f32 %v677_v39, 0.0  ;;  %v681_v57 = vadd.f32 %v680_v47, %v4614_v49  ;;  %v682_v58 = vpop.f32.mrb[15].mxu0  ;;  %v732_v59 = vadd.f32 %v731_v53, %v4623_v54  ;;  %v733_v60 = vpop.f32.mrb[14].mxu1  ;;  %v3974_v22 = vld [vmem:[#allocation8 + $0x5a4] ss:$16 sps:$4 sm:$0xff]  }
 0x17f   :  { %2467 = vmatpush1.bf16.msra.mxu0 %v3942_v29  ;;  %2574 = vmatprep.subr.bf16.mxu1 %v3953_v34  ;;  %v759_v62 = vmax.f32 %v679_v45, 0.0  ;;  %v683_v63 = vadd.f32 %v682_v58, %v4617_v51  ;;  %v760_v1 = vmax.f32 %v730_v48, 0.0  ;;  %v734_v2 = vadd.f32 %v733_v60, %v4620_v52  ;;  %v735_v3 = vpop.f32.mrb[15].mxu1  ;;  %v3965_v51 = vld [vmem:[#allocation8 + $0x16c] ss:$16 sps:$4 sm:$0xff]  }
 0x180   :  { %2468 = vmatprep.subr.bf16.mxu0 %v3950_v38  ;;  %v766_v4 = vmax.f32 %v681_v57, 0.0  ;;  %v761_v5 = vmax.f32 %v732_v59, 0.0  ;;  %v736_v49 = vadd.f32 %v735_v3, %v4623_v54  ;;  %v3963_v54 = vld [vmem:[#allocation8 + $0x168] ss:$16 sps:$4 sm:$0xff]   ;;  %v3972_v29 = vld [vmem:[#allocation8 + $0x5a0] ss:$16 sps:$4 sm:$0xff]  }
 0x181   :  { %v767_v6 = vmax.f32 %v683_v63, 0.0  ;;  %v768_v7 = vmax.f32 %v734_v2, 0.0  ;;  %v3983_v34 = vld [vmem:[#allocation8 + $0x1cc] ss:$16 sps:$4 sm:$0xff]   ;;  %v3980_v36 = vld [vmem:[#allocation8 + $0x5c4] ss:$16 sps:$4 sm:$0xff]  }
 0x182   :  { %2575 = vmatpush1.bf16.msra.mxu1 %v3951_v55  ;;  %v4650_v9 = vpack.c.bf16 %v766_v4, %v758_v56  ;;  %v769_v10 = vmax.f32 %v736_v49, 0.0  ;;  %v3981_v38 = vld [vmem:[#allocation8 + $0x1c8] ss:$16 sps:$4 sm:$0xff]   ;;  %v3978_v39 = vld [vmem:[#allocation8 + $0x5c0] ss:$16 sps:$4 sm:$0xff]  }
 0x183   :  { %2469 = vmatpush1.bf16.msra.mxu0 %v3948_v43  ;;  %2576 = vmatprep.subr.bf16.mxu1 %v3959_v61  ;;  %v4652_v19 = vpack.c.bf16 %v767_v6, %v759_v62  ;;  %v4654_v52 = vpack.c.bf16 %v768_v7, %v760_v1  ;;  %v3989_v40 = vld [vmem:[#allocation8 + $0x1ec] ss:$16 sps:$4 sm:$0xff]   ;;  %v3986_v42 = vld [vmem:[#allocation8 + $0x5e4] ss:$16 sps:$4 sm:$0xff]   ;;  %v3987_v43 = vld [vmem:[#allocation8 + $0x1e8] ss:$16 sps:$4 sm:$0xff]  }
 0x184   :  { %2470 = vmatprep.subr.bf16.mxu0 %v3956_v15  ;;  %v4656_v11 = vpack.c.bf16 %v769_v10, %v761_v5  ;;  %v3984_v45 = vld [vmem:[#allocation8 + $0x5e0] ss:$16 sps:$4 sm:$0xff]   ;;  %v3995_v47 = vld [vmem:[#allocation8 + $0x20c] ss:$16 sps:$4 sm:$0xff]   ;;  %v3992_v48 = vld [vmem:[#allocation8 + $0x604] ss:$16 sps:$4 sm:$0xff]  }
 0x185   :  { %v3990_v53 = vld [vmem:[#allocation8 + $0x600] ss:$16 sps:$4 sm:$0xff]   ;;  %v3993_v55 = vld [vmem:[#allocation8 + $0x208] ss:$16 sps:$4 sm:$0xff]   ;;  %v3998_v56 = vld [vmem:[#allocation8 + $0x624] ss:$16 sps:$4 sm:$0xff]  }
 0x186   :  { %2577 = vmatpush1.bf16.msra.mxu1 %v3957_v8  ;;  %v4001_v57 = vld [vmem:[#allocation8 + $0x22c] ss:$16 sps:$4 sm:$0xff]   ;;  %v3996_v58 = vld [vmem:[#allocation8 + $0x620] ss:$16 sps:$4 sm:$0xff]   ;;  %v3999_v59 = vld [vmem:[#allocation8 + $0x228] ss:$16 sps:$4 sm:$0xff]  }
 0x187   :  { %2471 = vmatpush1.bf16.msra.mxu0 %v3954_v12  ;;  %2578 = vmatprep.subr.bf16.mxu1 %v3965_v51  ;;  %v4004_v60 = vld [vmem:[#allocation8 + $0x644] ss:$16 sps:$4 sm:$0xff]   ;;  %v4007_v61 = vld [vmem:[#allocation8 + $0x24c] ss:$16 sps:$4 sm:$0xff]   ;;  %v4002_v62 = vld [vmem:[#allocation8 + $0x640] ss:$16 sps:$4 sm:$0xff]  }
 0x188   :  { %2472 = vmatprep.subr.bf16.mxu0 %v3962_v23  ;;  %v4005_v63 = vld [vmem:[#allocation8 + $0x248] ss:$16 sps:$4 sm:$0xff]   ;;  %v4013_v1 = vld [vmem:[#allocation8 + $0x26c] ss:$16 sps:$4 sm:$0xff]   ;;  %v4016_v3 = vld [vmem:[#allocation8 + $0x684] ss:$16 sps:$4 sm:$0xff]  }
 0x189   :  { %v4011_v2 = vld [vmem:[#allocation8 + $0x268] ss:$16 sps:$4 sm:$0xff]   ;;  %v4019_v15 = vld [vmem:[#allocation8 + $0x28c] ss:$16 sps:$4 sm:$0xff]   ;;  %v4014_v4 = vld [vmem:[#allocation8 + $0x680] ss:$16 sps:$4 sm:$0xff]  }
 0x18a   :  { %2579 = vmatpush1.bf16.msra.mxu1 %v3963_v54  ;;  %v4017_v5 = vld [vmem:[#allocation8 + $0x288] ss:$16 sps:$4 sm:$0xff]   ;;  %v4020_v49 = vld [vmem:[#allocation8 + $0x6a0] ss:$16 sps:$4 sm:$0xff]   ;;  %v4028_v7 = vld [vmem:[#allocation8 + $0x6c4] ss:$16 sps:$4 sm:$0xff]  }
 0x18b   :  { %2473 = vmatpush1.bf16.msra.mxu0 %v3960_v24  ;;  %2580 = vmatprep.subr.bf16.mxu1 %v3971_v0  ;;  %v4023_v6 = vld [vmem:[#allocation8 + $0x2a8] ss:$16 sps:$4 sm:$0xff]   ;;  %v4031_v8 = vld [vmem:[#allocation8 + $0x2cc] ss:$16 sps:$4 sm:$0xff]   ;;  %v4026_v10 = vld [vmem:[#allocation8 + $0x6c0] ss:$16 sps:$4 sm:$0xff]  }
 0x18c   :  { %2474 = vmatprep.subr.bf16.mxu0 %v3968_v25  ;;  %v4029_v12 = vld [vmem:[#allocation8 + $0x2c8] ss:$16 sps:$4 sm:$0xff]   ;;  %v4034_v51 = vld [vmem:[#allocation8 + $0x6e4] ss:$16 sps:$4 sm:$0xff]   ;;  %v4037_v23 = vld [vmem:[#allocation8 + $0x2ec] ss:$16 sps:$4 sm:$0xff]  }
 0x18d   :  { %v4032_v54 = vld [vmem:[#allocation8 + $0x6e0] ss:$16 sps:$4 sm:$0xff]   ;;  %v4035_v24 = vld [vmem:[#allocation8 + $0x2e8] ss:$16 sps:$4 sm:$0xff]   ;;  %v4040_v0 = vld [vmem:[#allocation8 + $0x704] ss:$16 sps:$4 sm:$0xff]  }
 0x18e   :  { %2581 = vmatpush1.bf16.msra.mxu1 %v3969_v20  ;;  %v4043_v25 = vld [vmem:[#allocation8 + $0x30c] ss:$16 sps:$4 sm:$0xff]   ;;  %v4038_v20 = vld [vmem:[#allocation8 + $0x700] ss:$16 sps:$4 sm:$0xff]  }
 0x18f   :  { %2475 = vmatpush1.bf16.msra.mxu0 %v3966_v28  ;;  %2582 = vmatprep.subr.bf16.mxu1 %v3977_v30  ;;  %v4041_v28 = vld [vmem:[#allocation8 + $0x308] ss:$16 sps:$4 sm:$0xff]   ;;  %v4046_v30 = vld [vmem:[#allocation8 + $0x724] ss:$16 sps:$4 sm:$0xff]  }
 0x190   :  { %2476 = vmatprep.subr.bf16.mxu0 %v3974_v22  ;;  %v4049_v22 = vld [vmem:[#allocation8 + $0x32c] ss:$16 sps:$4 sm:$0xff]  }
 0x192   :  { %2583 = vmatpush1.bf16.msra.mxu1 %v3975_v33  ;;  %v4044_v33 = vld [vmem:[#allocation8 + $0x720] ss:$16 sps:$4 sm:$0xff]  }
 0x193   :  { %2477 = vmatpush1.bf16.msra.mxu0 %v3972_v29  ;;  %2584 = vmatprep.subr.bf16.mxu1 %v3983_v34  ;;  %v4047_v29 = vld [vmem:[#allocation8 + $0x328] ss:$16 sps:$4 sm:$0xff]   ;;  %v4052_v34 = vld [vmem:[#allocation8 + $0x744] ss:$16 sps:$4 sm:$0xff]  }
 0x194   :  { %2478 = vmatprep.subr.bf16.mxu0 %v3980_v36  ;;  %v4055_v36 = vld [vmem:[#allocation8 + $0x34c] ss:$16 sps:$4 sm:$0xff]  }
 0x196   :  { %2585 = vmatpush1.bf16.msra.mxu1 %v3981_v38  ;;  %v4050_v38 = vld [vmem:[#allocation8 + $0x740] ss:$16 sps:$4 sm:$0xff]  }
 0x197   :  { %2479 = vmatpush1.bf16.msra.mxu0 %v3978_v39  ;;  %2586 = vmatprep.subr.bf16.mxu1 %v3989_v40  ;;  %v4053_v39 = vld [vmem:[#allocation8 + $0x348] ss:$16 sps:$4 sm:$0xff]   ;;  %v4058_v40 = vld [vmem:[#allocation8 + $0x764] ss:$16 sps:$4 sm:$0xff]  }
 0x198   :  { %2480 = vmatprep.subr.bf16.mxu0 %v3986_v42  ;;  %v4061_v42 = vld [vmem:[#allocation8 + $0x36c] ss:$16 sps:$4 sm:$0xff]  }
 0x19a   :  { %2587 = vmatpush1.bf16.msra.mxu1 %v3987_v43  ;;  %v4056_v43 = vld [vmem:[#allocation8 + $0x760] ss:$16 sps:$4 sm:$0xff]  }
 0x19b   :  { %2481 = vmatpush1.bf16.msra.mxu0 %v3984_v45  ;;  %2609 = vmatprep.subr.bf16.mxu1 %v3995_v47  ;;  %v4059_v45 = vld [vmem:[#allocation8 + $0x368] ss:$16 sps:$4 sm:$0xff]   ;;  %v4064_v47 = vld [vmem:[#allocation8 + $0x784] ss:$16 sps:$4 sm:$0xff]  }
 0x19c   :  { %2503 = vmatprep.subr.bf16.mxu0 %v3992_v48  ;;  %v4067_v48 = vld [vmem:[#allocation8 + $0x38c] ss:$16 sps:$4 sm:$0xff]  }
 0x19d   :  { %2589 = vmatmul.mubr.bf16.vlgmr.msra.gmra.mrb[24].mxu1 %v4586_v44  ;;  %v4010_v44 = vld [vmem:[#allocation8 + $0x664] ss:$16 sps:$4 sm:$0xff]  }
 0x19e   :  { %2483 = vmatmul.mubr.bf16.vlgmr.msra.gmra.mrb[16].mxu0 %v4633_v32  ;;  %2598 = vmatprep.mubr.bf16.mxu1 %v4599_v26  ;;  %v4008_v26 = vld [vmem:[#allocation8 + $0x660] ss:$16 sps:$4 sm:$0xff]  }
 0x19f   :  { %2504 = vmatpush1.bf16.msra.mxu0 %v3990_v53  ;;  %2610 = vmatpush1.bf16.msra.mxu1 %v3993_v55  ;;  %v4062_v53 = vld [vmem:[#allocation8 + $0x780] ss:$16 sps:$4 sm:$0xff]   ;;  %v4065_v55 = vld [vmem:[#allocation8 + $0x388] ss:$16 sps:$4 sm:$0xff]  }
 0x1a0   :  { %2505 = vmatprep.subr.bf16.mxu0 %v3998_v56  ;;  %2611 = vmatprep.subr.bf16.mxu1 %v4001_v57  ;;  %v4070_v56 = vld [vmem:[#allocation8 + $0x7a4] ss:$16 sps:$4 sm:$0xff]   ;;  %v4073_v57 = vld [vmem:[#allocation8 + $0x3ac] ss:$16 sps:$4 sm:$0xff]  }
 0x1a1   :  { %2492 = vmatprep.mubr.bf16.mxu0 %v4652_v19 }
 0x1a3   :  { %2506 = vmatpush1.bf16.msra.mxu0 %v3996_v58  ;;  %2612 = vmatpush1.bf16.msra.mxu1 %v3999_v59  ;;  %v4068_v58 = vld [vmem:[#allocation8 + $0x7a0] ss:$16 sps:$4 sm:$0xff]   ;;  %v4071_v59 = vld [vmem:[#allocation8 + $0x3a8] ss:$16 sps:$4 sm:$0xff]  }
 0x1a4   :  { %2507 = vmatprep.subr.bf16.mxu0 %v4004_v60  ;;  %2613 = vmatprep.subr.bf16.mxu1 %v4007_v61  ;;  %v4076_v60 = vld [vmem:[#allocation8 + $0x7c4] ss:$16 sps:$4 sm:$0xff]   ;;  %v4079_v61 = vld [vmem:[#allocation8 + $0x3cc] ss:$16 sps:$4 sm:$0xff]  }
 0x1a5   :  { %2599 = vmatmul.mubr.bf16.gmra.mrb[28].mxu1 %v4597_v21  ;;  %v4022_v21 = vld [vmem:[#allocation8 + $0x6a4] ss:$16 sps:$4 sm:$0xff]  }
 0x1a6   :  { %2641 = vmatprep.mubr.bf16.mxu1 %v4590_v50  ;;  %2493 = vmatmul.mubr.bf16.gmra.mrb[20].mxu0 %v4650_v9  ;;  %v4025_v50 = vld [vmem:[#allocation8 + $0x2ac] ss:$16 sps:$4 sm:$0xff]  }
 0x1a7   :  { %2508 = vmatpush1.bf16.msra.mxu0 %v4002_v62  ;;  %2614 = vmatpush1.bf16.msra.mxu1 %v4005_v63  ;;  %v4074_v62 = vld [vmem:[#allocation8 + $0x7c0] ss:$16 sps:$4 sm:$0xff]   ;;  %v4077_v63 = vld [vmem:[#allocation8 + $0x3c8] ss:$16 sps:$4 sm:$0xff]  }
 0x1a8   :  { %2509 = vmatprep.subr.bf16.mxu0 %v4010_v44  ;;  %2615 = vmatprep.subr.bf16.mxu1 %v4013_v1  ;;  %v4082_v44 = vld [vmem:[#allocation8 + $0x7e4] ss:$16 sps:$4 sm:$0xff]   ;;  %v4085_v1 = vld [vmem:[#allocation8 + $0x3ec] ss:$16 sps:$4 sm:$0xff]  }
 0x1a9   :  { %2535 = vmatprep.mubr.bf16.mxu0 %v4640_v41 }
 0x1ab   :  { %2510 = vmatpush1.bf16.msra.mxu0 %v4008_v26  ;;  %2616 = vmatpush1.bf16.msra.mxu1 %v4011_v2  ;;  %v4080_v26 = vld [vmem:[#allocation8 + $0x7e0] ss:$16 sps:$4 sm:$0xff]   ;;  %v4083_v2 = vld [vmem:[#allocation8 + $0x3e8] ss:$16 sps:$4 sm:$0xff]  }
 0x1ac   :  { %2511 = vmatprep.subr.bf16.mxu0 %v4016_v3  ;;  %2617 = vmatprep.subr.bf16.mxu1 %v4019_v15  ;;  %v4088_v3 = vld [vmem:[#allocation8 + $0x40c] ss:$16 sps:$4 sm:$0xff]   ;;  %v4086_v15 = vld [vmem:[#allocation8 + $0x408] ss:$16 sps:$4 sm:$0xff]  }
 0x1af   :  { %2512 = vmatpush1.bf16.msra.mxu0 %v4014_v4  ;;  %2618 = vmatpush1.bf16.msra.mxu1 %v4017_v5  ;;  %v4091_v4 = vld [vmem:[#allocation8 + $0x42c] ss:$16 sps:$4 sm:$0xff]   ;;  %v4089_v5 = vld [vmem:[#allocation8 + $0x428] ss:$16 sps:$4 sm:$0xff]  }
 0x1b0   :  { %2513 = vmatprep.subr.bf16.mxu0 %v4022_v21  ;;  %2619 = vmatprep.subr.bf16.mxu1 %v4025_v50  ;;  %v4094_v21 = vld [vmem:[#allocation8 + $0x44c] ss:$16 sps:$4 sm:$0xff]   ;;  %v4092_v50 = vld [vmem:[#allocation8 + $0x448] ss:$16 sps:$4 sm:$0xff]  }
 0x1b3   :  { %2514 = vmatpush1.bf16.msra.mxu0 %v4020_v49  ;;  %2620 = vmatpush1.bf16.msra.mxu1 %v4023_v6  ;;  %v4097_v49 = vld [vmem:[#allocation8 + $0x46c] ss:$16 sps:$4 sm:$0xff]   ;;  %v4182_v6 = vld [vmem:[#allocation10] ss:$8 sps:$4 sm:$0xff]  }
 0x1b4   :  { %2515 = vmatprep.subr.bf16.mxu0 %v4028_v7  ;;  %2621 = vmatprep.subr.bf16.mxu1 %v4031_v8  ;;  %v4184_v7 = vld [vmem:[#allocation10 + $0x4] ss:$8 sps:$4 sm:$0xff]  }
 0x1b5   :  { %v4100_v8 = vld [vmem:[#allocation8 + $0x48c] ss:$16 sps:$4 sm:$0xff]  }
 0x1b7   :  { %2516 = vmatpush1.bf16.msra.mxu0 %v4026_v10  ;;  %2622 = vmatpush1.bf16.msra.mxu1 %v4029_v12  ;;  %v4185_v10 = vld [vmem:[#allocation10 + $0x10] ss:$8 sps:$4 sm:$0xff]   ;;  %v4190_v12 = vld [vmem:[#allocation10 + $0x24] ss:$8 sps:$4 sm:$0xff]  }
 0x1b8   :  { %2517 = vmatprep.subr.bf16.mxu0 %v4034_v51  ;;  %2623 = vmatprep.subr.bf16.mxu1 %v4037_v23  ;;  %v4098_v51 = vld [vmem:[#allocation8 + $0x488] ss:$16 sps:$4 sm:$0xff]   ;;  %v4103_v23 = vld [vmem:[#allocation8 + $0x4ac] ss:$16 sps:$4 sm:$0xff]  }
 0x1bb   :  { %2518 = vmatpush1.bf16.msra.mxu0 %v4032_v54  ;;  %2624 = vmatpush1.bf16.msra.mxu1 %v4035_v24  ;;  %v4193_v54 = vld [vmem:[#allocation10 + $0x34] ss:$8 sps:$4 sm:$0xff]   ;;  %v4101_v24 = vld [vmem:[#allocation8 + $0x4a8] ss:$16 sps:$4 sm:$0xff]  }
 0x1bc   :  { %2519 = vmatprep.subr.bf16.mxu0 %v4040_v0  ;;  %2625 = vmatprep.subr.bf16.mxu1 %v4043_v25  ;;  %v4191_v0 = vld [vmem:[#allocation10 + $0x30] ss:$8 sps:$4 sm:$0xff]   ;;  %v4196_v25 = vld [vmem:[#allocation10 + $0x44] ss:$8 sps:$4 sm:$0xff]  }
 0x1bf   :  { %2520 = vmatpush1.bf16.msra.mxu0 %v4038_v20  ;;  %2626 = vmatpush1.bf16.msra.mxu1 %v4041_v28  ;;  %v4104_v20 = vld [vmem:[#allocation8 + $0x4c8] ss:$16 sps:$4 sm:$0xff]   ;;  %v4109_v28 = vld [vmem:[#allocation8 + $0x4ec] ss:$16 sps:$4 sm:$0xff]  }
 0x1c0   :  { %2521 = vmatprep.subr.bf16.mxu0 %v4046_v30  ;;  %2627 = vmatprep.subr.bf16.mxu1 %v4049_v22  ;;  %v4194_v30 = vld [vmem:[#allocation10 + $0x40] ss:$8 sps:$4 sm:$0xff]   ;;  %v4199_v22 = vld [vmem:[#allocation10 + $0x54] ss:$8 sps:$4 sm:$0xff]  }
 0x1c3   :  { %2522 = vmatpush1.bf16.msra.mxu0 %v4044_v33  ;;  %2628 = vmatpush1.bf16.msra.mxu1 %v4047_v29  ;;  %v4107_v33 = vld [vmem:[#allocation8 + $0x4e8] ss:$16 sps:$4 sm:$0xff]   ;;  %v4112_v29 = vld [vmem:[#allocation8 + $0x50c] ss:$16 sps:$4 sm:$0xff]  }
 0x1c4   :  { %2523 = vmatprep.subr.bf16.mxu0 %v4052_v34  ;;  %2629 = vmatprep.subr.bf16.mxu1 %v4055_v36  ;;  %v4197_v34 = vld [vmem:[#allocation10 + $0x50] ss:$8 sps:$4 sm:$0xff]   ;;  %v4202_v36 = vld [vmem:[#allocation10 + $0x64] ss:$8 sps:$4 sm:$0xff]  }
 0x1c7   :  { %2524 = vmatpush1.bf16.msra.mxu0 %v4050_v38  ;;  %2630 = vmatpush1.bf16.msra.mxu1 %v4053_v39  ;;  %v4110_v38 = vld [vmem:[#allocation8 + $0x508] ss:$16 sps:$4 sm:$0xff]   ;;  %v4115_v39 = vld [vmem:[#allocation8 + $0x52c] ss:$16 sps:$4 sm:$0xff]  }
 0x1c8   :  { %2525 = vmatprep.subr.bf16.mxu0 %v4058_v40  ;;  %2631 = vmatprep.subr.bf16.mxu1 %v4061_v42  ;;  %v4200_v40 = vld [vmem:[#allocation10 + $0x60] ss:$8 sps:$4 sm:$0xff]   ;;  %v4205_v42 = vld [vmem:[#allocation10 + $0x74] ss:$8 sps:$4 sm:$0xff]  }
 0x1cb   :  { %2526 = vmatpush1.bf16.msra.mxu0 %v4056_v43  ;;  %2632 = vmatpush1.bf16.msra.mxu1 %v4059_v45  ;;  %v4113_v43 = vld [vmem:[#allocation8 + $0x528] ss:$16 sps:$4 sm:$0xff]   ;;  %v4118_v45 = vld [vmem:[#allocation8 + $0x54c] ss:$16 sps:$4 sm:$0xff]  }
 0x1cc   :  { %2527 = vmatprep.subr.bf16.mxu0 %v4064_v47  ;;  %2633 = vmatprep.subr.bf16.mxu1 %v4067_v48  ;;  %v4203_v47 = vld [vmem:[#allocation10 + $0x70] ss:$8 sps:$4 sm:$0xff]   ;;  %v4208_v48 = vld [vmem:[#allocation10 + $0x84] ss:$8 sps:$4 sm:$0xff]  }
 0x1cf   :  { %2528 = vmatpush1.bf16.msra.mxu0 %v4062_v53  ;;  %2634 = vmatpush1.bf16.msra.mxu1 %v4065_v55  ;;  %v4116_v53 = vld [vmem:[#allocation8 + $0x548] ss:$16 sps:$4 sm:$0xff]   ;;  %v4121_v55 = vld [vmem:[#allocation8 + $0x56c] ss:$16 sps:$4 sm:$0xff]  }
 0x1d0   :  { %2529 = vmatprep.subr.bf16.mxu0 %v4070_v56  ;;  %2635 = vmatprep.subr.bf16.mxu1 %v4073_v57  ;;  %v4206_v56 = vld [vmem:[#allocation10 + $0x80] ss:$8 sps:$4 sm:$0xff]   ;;  %v4211_v57 = vld [vmem:[#allocation10 + $0x94] ss:$8 sps:$4 sm:$0xff]  }
 0x1d3   :  { %2530 = vmatpush1.bf16.msra.mxu0 %v4068_v58  ;;  %2636 = vmatpush1.bf16.msra.mxu1 %v4071_v59  ;;  %v4119_v58 = vld [vmem:[#allocation8 + $0x568] ss:$16 sps:$4 sm:$0xff]   ;;  %v4124_v59 = vld [vmem:[#allocation8 + $0x58c] ss:$16 sps:$4 sm:$0xff]  }
 0x1d4   :  { %2531 = vmatprep.subr.bf16.mxu0 %v4076_v60  ;;  %2637 = vmatprep.subr.bf16.mxu1 %v4079_v61  ;;  %v4209_v60 = vld [vmem:[#allocation10 + $0x90] ss:$8 sps:$4 sm:$0xff]   ;;  %v4214_v61 = vld [vmem:[#allocation10 + $0xa4] ss:$8 sps:$4 sm:$0xff]  }
 0x1d7   :  { %2532 = vmatpush1.bf16.msra.mxu0 %v4074_v62  ;;  %2638 = vmatpush1.bf16.msra.mxu1 %v4077_v63  ;;  %v4122_v62 = vld [vmem:[#allocation8 + $0x588] ss:$16 sps:$4 sm:$0xff]   ;;  %v4127_v63 = vld [vmem:[#allocation8 + $0x5ac] ss:$16 sps:$4 sm:$0xff]  }
 0x1d8   :  { %2533 = vmatprep.subr.bf16.mxu0 %v4082_v44  ;;  %2639 = vmatprep.subr.bf16.mxu1 %v4085_v1  ;;  %v4212_v44 = vld [vmem:[#allocation10 + $0xa0] ss:$8 sps:$4 sm:$0xff]   ;;  %v4217_v1 = vld [vmem:[#allocation10 + $0xb4] ss:$8 sps:$4 sm:$0xff]  }
 0x1db   :  { %2534 = vmatpush1.bf16.msra.mxu0 %v4080_v26  ;;  %2640 = vmatpush1.bf16.msra.mxu1 %v4083_v2  ;;  %v4125_v26 = vld [vmem:[#allocation8 + $0x5a8] ss:$16 sps:$4 sm:$0xff]   ;;  %v4130_v2 = vld [vmem:[#allocation8 + $0x5cc] ss:$16 sps:$4 sm:$0xff]  }
 0x1dc   :  { %2662 = vmatprep.subr.bf16.mxu1 %v4088_v3  ;;  %3188 = vmatprep.subr.bf16.mxu0 %v4184_v7  ;;  %v4215_v3 = vld [vmem:[#allocation10 + $0xb0] ss:$8 sps:$4 sm:$0xff]  }
 0x1dd   :  { %v4221_v7 = vld [vmem:[#allocation10 + $0xd0] ss:$8 sps:$4 sm:$0xff]  }
 0x1de   :  { %2536 = vmatmul.mubr.bf16.vlgmr.msra.gmra.mrb[16].mxu0 %v4637_v37  ;;  %2642 = vmatmul.mubr.bf16.vlgmr.msra.gmra.mrb[24].mxu1 %v4588_v46  ;;  %v4095_v46 = vld [vmem:[#allocation8 + $0x468] ss:$16 sps:$4 sm:$0xff]  }
 0x1df   :  { %2651 = vmatprep.mubr.bf16.mxu1 %v4603_v31  ;;  %2663 = vmatpush1.bf16.msra.mxu1 %v4086_v15  ;;  %v4187_v31 = vld [vmem:[#allocation10 + $0x14] ss:$8 sps:$4 sm:$0xff]   ;;  %v4220_v15 = vld [vmem:[#allocation10 + $0xc4] ss:$8 sps:$4 sm:$0xff]  }
 0x1e0   :  { %2664 = vmatprep.subr.bf16.mxu1 %v4091_v4  ;;  %2545 = vmatprep.mubr.bf16.mxu0 %v4656_v11  ;;  %v4128_v4 = vld [vmem:[#allocation8 + $0x5c8] ss:$16 sps:$4 sm:$0xff]  }
 0x1e1   :  { %3189 = vmatpush1.bf16.msra.mxu0 %v4182_v6  ;;  %v4136_v6 = vld [vmem:[#allocation8 + $0x60c] ss:$16 sps:$4 sm:$0xff]  }
 0x1e2   :  { %3190 = vmatprep.subr.bf16.mxu0 %v4187_v31  ;;  %v4139_v31 = vld [vmem:[#allocation8 + $0x62c] ss:$16 sps:$4 sm:$0xff]  }
 0x1e3   :  { %2665 = vmatpush1.bf16.msra.mxu1 %v4089_v5  ;;  %v4133_v5 = vld [vmem:[#allocation8 + $0x5ec] ss:$16 sps:$4 sm:$0xff]  }
 0x1e4   :  { %2666 = vmatprep.subr.bf16.mxu1 %v4094_v21  ;;  %v4218_v21 = vld [vmem:[#allocation10 + $0xc0] ss:$8 sps:$4 sm:$0xff]  }
 0x1e5   :  { %3191 = vmatpush1.bf16.msra.mxu0 %v4185_v10  ;;  %v4142_v10 = vld [vmem:[#allocation8 + $0x64c] ss:$16 sps:$4 sm:$0xff]  }
 0x1e6   :  { %2546 = vmatmul.mubr.bf16.gmra.mrb[20].mxu0 %v4654_v52  ;;  %2652 = vmatmul.mubr.bf16.gmra.mrb[28].mxu1 %v4601_v27  ;;  %v4188_v27 = vld [vmem:[#allocation10 + $0x20] ss:$8 sps:$4 sm:$0xff]  }
 0x1e7   :  { %2667 = vmatpush1.bf16.msra.mxu1 %v4092_v50  ;;  %2694 = vmatprep.mubr.bf16.mxu1 %v4635_v35  ;;  %v4106_v35 = vld [vmem:[#allocation8 + $0x4cc] ss:$16 sps:$4 sm:$0xff]  }
 0x1e8   :  { %2668 = vmatprep.subr.bf16.mxu1 %v4097_v49  ;;  %3192 = vmatprep.subr.bf16.mxu0 %v4190_v12  ;;  %v4223_v50 = vld [vmem:[#allocation10 + $0xd4] ss:$8 sps:$4 sm:$0xff]   ;;  %v4131_v49 = vld [vmem:[#allocation8 + $0x5e8] ss:$16 sps:$4 sm:$0xff]  }
 0x1e9   :  { %3193 = vmatpush1.bf16.msra.mxu0 %v4188_v27  ;;  %v4140_v12 = vld [vmem:[#allocation8 + $0x648] ss:$16 sps:$4 sm:$0xff]   ;;  %v4148_v27 = vld [vmem:[#allocation8 + $0x68c] ss:$16 sps:$4 sm:$0xff]  }
 0x1ea   :  { %3194 = vmatprep.subr.bf16.mxu0 %v4193_v54  ;;  %v4149_v54 = vld [vmem:[#allocation8 + $0x6a8] ss:$16 sps:$4 sm:$0xff]  }
 0x1eb   :  { %2669 = vmatpush1.bf16.msra.mxu1 %v4095_v46  ;;  %v4134_v46 = vld [vmem:[#allocation8 + $0x608] ss:$16 sps:$4 sm:$0xff]  }
 0x1ec   :  { %2670 = vmatprep.subr.bf16.mxu1 %v4100_v8  ;;  %v4137_v8 = vld [vmem:[#allocation8 + $0x628] ss:$16 sps:$4 sm:$0xff]  }
 0x1ed   :  { %3195 = vmatpush1.bf16.msra.mxu0 %v4191_v0 }
 0x1ee   :  { %3196 = vmatprep.subr.bf16.mxu0 %v4196_v25 }
 0x1ef   :  { %2671 = vmatpush1.bf16.msra.mxu1 %v4098_v51  ;;  %v4145_v51 = vld [vmem:[#allocation8 + $0x66c] ss:$16 sps:$4 sm:$0xff]  }
 0x1f0   :  { %2672 = vmatprep.subr.bf16.mxu1 %v4103_v23  ;;  %v4143_v23 = vld [vmem:[#allocation8 + $0x668] ss:$16 sps:$4 sm:$0xff]  }
 0x1f1   :  { %3197 = vmatpush1.bf16.msra.mxu0 %v4194_v30  ;;  %v4157_v30 = vld [vmem:[#allocation8 + $0x6ec] ss:$16 sps:$4 sm:$0xff]  }
 0x1f2   :  { %3198 = vmatprep.subr.bf16.mxu0 %v4199_v22  ;;  %v4229_v22 = vld [vmem:[#allocation10 + $0xf4] ss:$8 sps:$4 sm:$0xff]  }
 0x1f3   :  { %2673 = vmatpush1.bf16.msra.mxu1 %v4101_v24 }
 0x1f4   :  { %2674 = vmatprep.subr.bf16.mxu1 %v4106_v35  ;;  %v4154_v35 = vld [vmem:[#allocation8 + $0x6cc] ss:$16 sps:$4 sm:$0xff]  }
 0x1f5   :  { %3199 = vmatpush1.bf16.msra.mxu0 %v4197_v34  ;;  %v4160_v34 = vld [vmem:[#allocation8 + $0x70c] ss:$16 sps:$4 sm:$0xff]  }
 0x1f6   :  { %3200 = vmatprep.subr.bf16.mxu0 %v4202_v36 }
 0x1f7   :  { %2675 = vmatpush1.bf16.msra.mxu1 %v4104_v20  ;;  %v4152_v20 = vld [vmem:[#allocation8 + $0x6c8] ss:$16 sps:$4 sm:$0xff]  }
 0x1f8   :  { %2676 = vmatprep.subr.bf16.mxu1 %v4109_v28  ;;  %v4224_v28 = vld [vmem:[#allocation10 + $0xe0] ss:$8 sps:$4 sm:$0xff]  }
 0x1f9   :  { %3201 = vmatpush1.bf16.msra.mxu0 %v4200_v40  ;;  %v4158_v40 = vld [vmem:[#allocation8 + $0x708] ss:$16 sps:$4 sm:$0xff]  }
 0x1fa   :  { %3202 = vmatprep.subr.bf16.mxu0 %v4205_v42 }
 0x1fb   :  { %2677 = vmatpush1.bf16.msra.mxu1 %v4107_v33  ;;  %v4155_v33 = vld [vmem:[#allocation8 + $0x6e8] ss:$16 sps:$4 sm:$0xff]  }
 0x1fc   :  { %2678 = vmatprep.subr.bf16.mxu1 %v4112_v29  ;;  %v4227_v29 = vld [vmem:[#allocation10 + $0xf0] ss:$8 sps:$4 sm:$0xff]  }
 0x1fd   :  { %3203 = vmatpush1.bf16.msra.mxu0 %v4203_v47  ;;  %v4166_v47 = vld [vmem:[#allocation8 + $0x74c] ss:$16 sps:$4 sm:$0xff]  }
 0x1fe   :  { %3204 = vmatprep.subr.bf16.mxu0 %v4208_v48  ;;  %v4164_v48 = vld [vmem:[#allocation8 + $0x748] ss:$16 sps:$4 sm:$0xff]  }
 0x1ff   :  { %2679 = vmatpush1.bf16.msra.mxu1 %v4110_v38 }
 0x200   :  { %2680 = vmatprep.subr.bf16.mxu1 %v4115_v39 }
 0x201   :  { %3205 = vmatpush1.bf16.msra.mxu0 %v4206_v56  ;;  %v4167_v56 = vld [vmem:[#allocation8 + $0x768] ss:$16 sps:$4 sm:$0xff]  }
 0x202   :  { %3206 = vmatprep.subr.bf16.mxu0 %v4211_v57  ;;  %v4172_v57 = vld [vmem:[#allocation8 + $0x78c] ss:$16 sps:$4 sm:$0xff]  }
 0x203   :  { %2681 = vmatpush1.bf16.msra.mxu1 %v4113_v43  ;;  %v4163_v43 = vld [vmem:[#allocation8 + $0x72c] ss:$16 sps:$4 sm:$0xff]  }
 0x204   :  { %2682 = vmatprep.subr.bf16.mxu1 %v4118_v45  ;;  %v4161_v45 = vld [vmem:[#allocation8 + $0x728] ss:$16 sps:$4 sm:$0xff]  }
 0x205   :  { %3207 = vmatpush1.bf16.msra.mxu0 %v4209_v60  ;;  %v4173_v60 = vld [vmem:[#allocation8 + $0x7a8] ss:$16 sps:$4 sm:$0xff]  }
 0x206   :  { %3208 = vmatprep.subr.bf16.mxu0 %v4214_v61  ;;  %v4178_v61 = vld [vmem:[#allocation8 + $0x7cc] ss:$16 sps:$4 sm:$0xff]  }
 0x207   :  { %2683 = vmatpush1.bf16.msra.mxu1 %v4116_v53  ;;  %v4169_v53 = vld [vmem:[#allocation8 + $0x76c] ss:$16 sps:$4 sm:$0xff]  }
 0x208   :  { %2684 = vmatprep.subr.bf16.mxu1 %v4121_v55  ;;  %v4232_v55 = vld [vmem:[#allocation10 + $0x104] ss:$8 sps:$4 sm:$0xff]  }
 0x209   :  { %3209 = vmatpush1.bf16.msra.mxu0 %v4212_v44  ;;  %v4179_v44 = vld [vmem:[#allocation8 + $0x7e8] ss:$16 sps:$4 sm:$0xff]  }
 0x20a   :  { %3210 = vmatprep.subr.bf16.mxu0 %v4217_v1  ;;  %v4695_v1 = vld [vmem:[%s4737_s4] sm:$0xf] }
 0x20b   :  { %2685 = vmatpush1.bf16.msra.mxu1 %v4119_v58  ;;  %v4170_v58 = vld [vmem:[#allocation8 + $0x788] ss:$16 sps:$4 sm:$0xff]  }
 0x20c   :  { %2686 = vmatprep.subr.bf16.mxu1 %v4124_v59  ;;  %v4175_v59 = vld [vmem:[#allocation8 + $0x7ac] ss:$16 sps:$4 sm:$0xff]  }
 0x20d   :  { %3211 = vmatpush1.bf16.msra.mxu0 %v4215_v3 }
 0x20e   :  { %3212 = vmatprep.subr.bf16.mxu0 %v4220_v15 }
 0x20f   :  { %2687 = vmatpush1.bf16.msra.mxu1 %v4122_v62  ;;  %v4176_v62 = vld [vmem:[#allocation8 + $0x7c8] ss:$16 sps:$4 sm:$0xff]  }
 0x210   :  { %2688 = vmatprep.subr.bf16.mxu1 %v4127_v63  ;;  %v4181_v63 = vld [vmem:[#allocation8 + $0x7ec] ss:$16 sps:$4 sm:$0xff]  }
 0x211   :  { %3213 = vmatpush1.bf16.msra.mxu0 %v4218_v21 }
 0x212   :  { %3214 = vmatprep.subr.bf16.mxu0 %v4223_v50 }
 0x213   :  { %2689 = vmatpush1.bf16.msra.mxu1 %v4125_v26  ;;  %v1047_v26 = vrot.slane %v4695_v1, %v4563_v14 }
 0x214   :  { %2690 = vmatprep.subr.bf16.mxu1 %v4130_v2  ;;  %v1051_v2 = vrot.slane %v4695_v1, %v4569_v17 }
 0x215   :  { %3215 = vmatpush1.bf16.msra.mxu0 %v4221_v7 }
 0x217   :  { %2691 = vmatpush1.bf16.msra.mxu1 %v4128_v4 }
 0x218   :  { %2692 = vmatprep.subr.bf16.mxu1 %v4133_v5 }
 0x21b   :  { %2693 = vmatpush1.bf16.msra.mxu1 %v4131_v49 }
 0x21c   :  { %2715 = vmatprep.subr.bf16.mxu1 %v4136_v6 }
 0x21e   :  { %2695 = vmatmul.mubr.bf16.vlgmr.msra.gmra.mrb[24].mxu1 %v4633_v32  ;;  %v4146_v32 = vld [vmem:[#allocation8 + $0x688] ss:$16 sps:$4 sm:$0xff]  }
 0x21f   :  { %2704 = vmatprep.mubr.bf16.mxu1 %v4652_v19  ;;  %2716 = vmatpush1.bf16.msra.mxu1 %v4134_v46  ;;  %v4151_v19 = vld [vmem:[#allocation8 + $0x6ac] ss:$16 sps:$4 sm:$0xff]  }
 0x220   :  { %2717 = vmatprep.subr.bf16.mxu1 %v4139_v31 }
 0x223   :  { %2718 = vmatpush1.bf16.msra.mxu1 %v4137_v8 }
 0x224   :  { %2719 = vmatprep.subr.bf16.mxu1 %v4142_v10 }
 0x226   :  { %2705 = vmatmul.mubr.bf16.gmra.mrb[28].mxu1 %v4650_v9  ;;  %v4226_v9 = vld [vmem:[#allocation10 + $0xe4] ss:$8 sps:$4 sm:$0xff]  }
 0x227   :  { %2720 = vmatpush1.bf16.msra.mxu1 %v4140_v12  ;;  %2747 = vmatprep.mubr.bf16.mxu1 %v4640_v41 }
 0x228   :  { %2721 = vmatprep.subr.bf16.mxu1 %v4145_v51  ;;  %3216 = vmatprep.subr.bf16.mxu0 %v4226_v9 }
 0x229   :  { %3217 = vmatpush1.bf16.msra.mxu0 %v4224_v28 }
 0x22a   :  { %3218 = vmatprep.subr.bf16.mxu0 %v4229_v22  ;;  %v4233_v22 = vld [vmem:[#allocation10 + $0x110] ss:$8 sps:$4 sm:$0xff]  }
 0x22b   :  { %2722 = vmatpush1.bf16.msra.mxu1 %v4143_v23 }
 0x22c   :  { %2723 = vmatprep.subr.bf16.mxu1 %v4148_v27 }
 0x22d   :  { %3219 = vmatpush1.bf16.msra.mxu0 %v4227_v29 }
 0x22e   :  { %3241 = vmatprep.subr.bf16.mxu0 %v4232_v55  ;;  %v4245_v55 = vld [vmem:[#allocation10 + $0x150] ss:$8 sps:$4 sm:$0xff]  }
 0x22f   :  { %2724 = vmatpush1.bf16.msra.mxu1 %v4146_v32 }
 0x230   :  { %v4677_v24 = vpop.f32.mrb[16].mxu1  ;;  %2725 = vmatprep.subr.bf16.mxu1 %v4151_v19  ;;  %v4230_v19 = vld [vmem:[#allocation10 + $0x100] ss:$8 sps:$4 sm:$0xff]  }
 0x231   :  { %v4679_v0 = vpop.f32.mrb[17].mxu1  ;;  %v2379_v3 = vadd.f32 %v4677_v24, %v1047_v26 }
 0x232   :  { %v4681_v25 = vpop.f32.mrb[18].mxu1  ;;  %v2381_v15 = vadd.f32 %v4679_v0, %v1051_v2  ;;  %v4235_v0 = vld [vmem:[#allocation10 + $0x114] ss:$8 sps:$4 sm:$0xff]  }
 0x233   :  { %2726 = vmatpush1.bf16.msra.mxu1 %v4149_v54  ;;  %v4683_v41 = vpop.f32.mrb[19].mxu1 }
 0x234   :  { %2727 = vmatprep.subr.bf16.mxu1 %v4154_v35  ;;  %v2385_v5 = vadd.f32 %v4683_v41, %v1051_v2 }
 0x237   :  { %2728 = vmatpush1.bf16.msra.mxu1 %v4152_v20 }
 0x238   :  { %2729 = vmatprep.subr.bf16.mxu1 %v4157_v30  ;;  %v2388_v36 = vpop.f32.mrb[20].mxu1 }
 0x239   :  { %v2390_v38 = vpop.f32.mrb[21].mxu1  ;;  %v2389_v12 = vadd.f32 %v2388_v36, %v1047_v26 }
 0x23a   :  { %v4685_v39 = vpop.f32.mrb[22].mxu1  ;;  %v2391_v23 = vadd.f32 %v2390_v38, %v1051_v2 }
 0x23b   :  { %2730 = vmatpush1.bf16.msra.mxu1 %v4155_v33  ;;  %v4687_v42 = vpop.f32.mrb[23].mxu1  ;;  %v2393_v54 = vadd.f32 %v4685_v39, %v1047_v26 }
 0x23c   :  { %2731 = vmatprep.subr.bf16.mxu1 %v4160_v34  ;;  %v4238_v34 = vld [vmem:[#allocation10 + $0x124] ss:$8 sps:$4 sm:$0xff]  }
 0x23f   :  { %2732 = vmatpush1.bf16.msra.mxu1 %v4158_v40 }
 0x240   :  { %2733 = vmatprep.subr.bf16.mxu1 %v4163_v43  ;;  %v4236_v43 = vld [vmem:[#allocation10 + $0x120] ss:$8 sps:$4 sm:$0xff]  }
 0x243   :  { %2734 = vmatpush1.bf16.msra.mxu1 %v4161_v45  ;;  %v4239_v45 = vld [vmem:[#allocation10 + $0x130] ss:$8 sps:$4 sm:$0xff]  }
 0x244   :  { %2735 = vmatprep.subr.bf16.mxu1 %v4166_v47  ;;  %v4244_v47 = vld [vmem:[#allocation10 + $0x144] ss:$8 sps:$4 sm:$0xff]  }
 0x247   :  { %2736 = vmatpush1.bf16.msra.mxu1 %v4164_v48  ;;  %v4242_v48 = vld [vmem:[#allocation10 + $0x140] ss:$8 sps:$4 sm:$0xff]  }
 0x248   :  { %2737 = vmatprep.subr.bf16.mxu1 %v4169_v53  ;;  %v4247_v53 = vld [vmem:[#allocation10 + $0x154] ss:$8 sps:$4 sm:$0xff]  }
 0x24b   :  { %2738 = vmatpush1.bf16.msra.mxu1 %v4167_v56  ;;  %v4250_v56 = vld [vmem:[#allocation10 + $0x164] ss:$8 sps:$4 sm:$0xff]  }
 0x24c   :  { %2739 = vmatprep.subr.bf16.mxu1 %v4172_v57  ;;  %v4248_v57 = vld [vmem:[#allocation10 + $0x160] ss:$8 sps:$4 sm:$0xff]  }
 0x24f   :  { %2740 = vmatpush1.bf16.msra.mxu1 %v4170_v58  ;;  %v4253_v58 = vld [vmem:[#allocation10 + $0x174] ss:$8 sps:$4 sm:$0xff]  }
 0x250   :  { %2741 = vmatprep.subr.bf16.mxu1 %v4175_v59  ;;  %v4251_v59 = vld [vmem:[#allocation10 + $0x170] ss:$8 sps:$4 sm:$0xff]  }
 0x253   :  { %2742 = vmatpush1.bf16.msra.mxu1 %v4173_v60  ;;  %v4256_v60 = vld [vmem:[#allocation10 + $0x184] ss:$8 sps:$4 sm:$0xff]  }
 0x254   :  { %2743 = vmatprep.subr.bf16.mxu1 %v4178_v61  ;;  %v4254_v61 = vld [vmem:[#allocation10 + $0x180] ss:$8 sps:$4 sm:$0xff]  }
 0x257   :  { %2744 = vmatpush1.bf16.msra.mxu1 %v4176_v62  ;;  %v4259_v62 = vld [vmem:[#allocation10 + $0x194] ss:$8 sps:$4 sm:$0xff]  }
 0x258   :  { %2745 = vmatprep.subr.bf16.mxu1 %v4181_v63  ;;  %v4257_v63 = vld [vmem:[#allocation10 + $0x190] ss:$8 sps:$4 sm:$0xff]  }
 0x25b   :  { %2746 = vmatpush1.bf16.msra.mxu1 %v4179_v44  ;;  %v4262_v44 = vld [vmem:[#allocation10 + $0x1a4] ss:$8 sps:$4 sm:$0xff]  }
 0x25e   :  { %2748 = vmatmul.mubr.bf16.vlgmr.msra.gmra.mrb[24].mxu1 %v4637_v37 }
 0x25f   :  { %2757 = vmatprep.mubr.bf16.mxu1 %v4656_v11  ;;  %v2383_v11 = vadd.f32 %v4681_v25, %v1047_v26  ;;  %v2395_v25 = vadd.f32 %v4687_v42, %v1051_v2  ;;  %v4241_v42 = vld [vmem:[#allocation10 + $0x134] ss:$8 sps:$4 sm:$0xff]   ;;  %v4260_v26 = vld [vmem:[#allocation10 + $0x1a0] ss:$8 sps:$4 sm:$0xff]  }
 0x260   :  { %v4265_v2 = vld [vmem:[#allocation10 + $0x1b4] ss:$8 sps:$4 sm:$0xff]  }
 0x266   :  { %2758 = vmatmul.mubr.bf16.gmra.mrb[28].mxu1 %v4654_v52 }
 0x2b1   :  { %v2537_v37 = vpop.f32.mrb[16].mxu0 }
 0x2b2   :  { %v3706_v4 = vadd.f32 %v2537_v37, %v2379_v3  ;;  %v2539_v52 = vpop.f32.mrb[17].mxu0  ;;  %v4263_v3 = vld [vmem:[#allocation10 + $0x1b0] ss:$8 sps:$4 sm:$0xff]   ;;  %v4266_v37 = vld [vmem:[#allocation10 + $0x1c0] ss:$8 sps:$4 sm:$0xff]  }
 0x2b3   :  { %v3708_v21 = vadd.f32 %v2539_v52, %v2381_v15  ;;  %v2541_v50 = vpop.f32.mrb[18].mxu0  ;;  %v4268_v15 = vld [vmem:[#allocation10 + $0x1c4] ss:$8 sps:$4 sm:$0xff]  }
 0x2b4   :  { %v3710_v49 = vadd.f32 %v2541_v50, %v2383_v11  ;;  %v2543_v6 = vpop.f32.mrb[19].mxu0  ;;  %v2768_v46 = vmax.f32 %v3706_v4, 0.0  ;;  %v4271_v11 = vld [vmem:[#allocation10 + $0x1d4] ss:$8 sps:$4 sm:$0xff]   ;;  %v4269_v4 = vld [vmem:[#allocation10 + $0x1d0] ss:$8 sps:$4 sm:$0xff]  }
 0x2b5   :  { %v3712_v7 = vadd.f32 %v2543_v6, %v2385_v5  ;;  %v2769_v8 = vmax.f32 %v3708_v21, 0.0  ;;  %v4274_v52 = vld [vmem:[#allocation10 + $0x1e4] ss:$8 sps:$4 sm:$0xff]   ;;  %v4272_v5 = vld [vmem:[#allocation10 + $0x1e0] ss:$8 sps:$4 sm:$0xff]   ;;  %v1059_v6 = vrot.slane %v4695_v1, %v180_v18 }
 0x2b6   :  { %v2772_v31 = vmax.f32 %v3710_v49, 0.0  ;;  %v4277_v21 = vld [vmem:[#allocation10 + $0x1f4] ss:$8 sps:$4 sm:$0xff]   ;;  %v4275_v50 = vld [vmem:[#allocation10 + $0x1f0] ss:$8 sps:$4 sm:$0xff]   ;;  %v1055_v49 = vrot.slane %v4695_v1, %v176_v16 }
 0x2b7   :  { %v2773_v10 = vmax.f32 %v3712_v7, 0.0 }
 0x2b8   :  { %v2784_v51 = vpack.c.bf16 %v2772_v31, %v2768_v46 }
 0x2b9   :  { %v2785_v27 = vpack.c.bf16 %v2773_v10, %v2769_v8  ;;  %v2547_v32 = vpop.f32.mrb[20].mxu0 }
 0x2ba   :  { %v3714_v24 = vadd.f32 %v2547_v32, %v2389_v12  ;;  %v2549_v35 = vpop.f32.mrb[21].mxu0 }
 0x2bb   :  { %v3716_v9 = vadd.f32 %v2549_v35, %v2391_v23  ;;  %v2551_v41 = vpop.f32.mrb[22].mxu0  ;;  %3220 = vmatprep.mubr.bf16.mxu0 %v2785_v27 }
 0x2bc   :  { %v3718_v20 = vadd.f32 %v2551_v41, %v2393_v54  ;;  %v2553_v28 = vpop.f32.mrb[23].mxu0  ;;  %3221 = vmatmul.mubr.bf16.vlgmr.msra.gmra.mrb[24].mxu0 %v2784_v51  ;;  %v2776_v33 = vmax.f32 %v3714_v24, 0.0 }
 0x2bd   :  { %v3720_v30 = vadd.f32 %v2553_v28, %v2395_v25  ;;  %3242 = vmatpush1.bf16.msra.mxu0 %v4230_v19  ;;  %v2777_v36 = vmax.f32 %v3716_v9, 0.0 }
 0x2be   :  { %v2780_v29 = vmax.f32 %v3718_v20, 0.0  ;;  %3243 = vmatprep.subr.bf16.mxu0 %v4235_v0 }
 0x2bf   :  { %v2781_v38 = vmax.f32 %v3720_v30, 0.0 }
 0x2c0   :  { %v2788_v39 = vpack.c.bf16 %v2780_v29, %v2776_v33 }
 0x2c1   :  { %v2789_v40 = vpack.c.bf16 %v2781_v38, %v2777_v36  ;;  %3244 = vmatpush1.bf16.msra.mxu0 %v4233_v22 }
 0x2c2   :  { %3245 = vmatprep.subr.bf16.mxu0 %v4238_v34  ;;  %v2856_v34 = vld [vmem:[%s4739_s6] sm:$0x3]  ;;  %s4430_s6 = smov [#allocation11]  }
 0x2c3   :  { %3230 = vmatprep.mubr.bf16.mxu0 %v2789_v40  ;;  %v2861_v36 = vrot.slane %v2856_v34, %v4563_v14  ;;  %v2865_v38 = vrot.slane %v2856_v34, %v4569_v17  ;;  %s3307_s19 = sshll.u32 %s4430_s6, 4  ;;  %s3308_s19 = int_to_ptr.vmem [resolvable:$true] %s3307_s19 }
 0x2c4   :  { %3231 = vmatmul.mubr.bf16.gmra.mrb[28].mxu0 %v2788_v39  ;;  %s4388_s20 = scalar_lea.vmem %s3308_s19, 1024  ;;  %p4393_p13 = scmp.lt.s32.totalorder %s3308_s19, %s3308_s19 }
 0x2c5   :  { %3246 = vmatpush1.bf16.msra.mxu0 %v4236_v43  ;;  %p4389_p12 = scmp.ne.s32.totalorder %s3308_s19, %s4388_s20  ;;  %p4394_p0 = scmp.lt.s32.totalorder %s4388_s20, %s4388_s20 }
 0x2c6   :  { %3247 = vmatprep.subr.bf16.mxu0 %v4241_v42 }
 0x2c7   :  { %p4395_p1 = por %p4394_p0, %p4393_p13 }
 0x2c9   :  { %3248 = vmatpush1.bf16.msra.mxu0 %v4239_v45  ;;  %p4396_p2 = pnand %p4395_p1, %p4389_p12 }
 0x2ca   :  { %3249 = vmatprep.subr.bf16.mxu0 %v4244_v47 }
 0x2cd   :  { %3250 = vmatpush1.bf16.msra.mxu0 %v4242_v48 }
 0x2ce   :  { %3251 = vmatprep.subr.bf16.mxu0 %v4247_v53 }
 0x2d1   :  { %3252 = vmatpush1.bf16.msra.mxu0 %v4245_v55 }
 0x2d2   :  { %3253 = vmatprep.subr.bf16.mxu0 %v4250_v56 }
 0x2d5   :  { %3254 = vmatpush1.bf16.msra.mxu0 %v4248_v57 }
 0x2d6   :  { %3255 = vmatprep.subr.bf16.mxu0 %v4253_v58 }
 0x2d9   :  { %3256 = vmatpush1.bf16.msra.mxu0 %v4251_v59 }
 0x2da   :  { %3257 = vmatprep.subr.bf16.mxu0 %v4256_v60 }
 0x2dd   :  { %3258 = vmatpush1.bf16.msra.mxu0 %v4254_v61 }
 0x2de   :  { %3259 = vmatprep.subr.bf16.mxu0 %v4259_v62 }
 0x2e1   :  { %3260 = vmatpush1.bf16.msra.mxu0 %v4257_v63 }
 0x2e2   :  { %3261 = vmatprep.subr.bf16.mxu0 %v4262_v44 }
 0x2e5   :  { %3262 = vmatpush1.bf16.msra.mxu0 %v4260_v26 }
 0x2e6   :  { %3263 = vmatprep.subr.bf16.mxu0 %v4265_v2 }
 0x2e9   :  { %3264 = vmatpush1.bf16.msra.mxu0 %v4263_v3 }
 0x2ea   :  { %3265 = vmatprep.subr.bf16.mxu0 %v4268_v15 }
 0x2ed   :  { %3266 = vmatpush1.bf16.msra.mxu0 %v4266_v37 }
 0x2ee   :  { %3267 = vmatprep.subr.bf16.mxu0 %v4271_v11 }
 0x2f1   :  { %3268 = vmatpush1.bf16.msra.mxu0 %v4269_v4 }
 0x2f2   :  { %3269 = vmatprep.subr.bf16.mxu0 %v4274_v52 }
 0x2f5   :  { %3270 = vmatpush1.bf16.msra.mxu0 %v4272_v5 }
 0x2f6   :  { %3271 = vmatprep.subr.bf16.mxu0 %v4277_v21 }
 0x2f9   :  { %3272 = vmatpush1.bf16.msra.mxu0 %v4275_v50 }
 0x331   :  { %v2749_v7 = vpop.f32.mrb[24].mxu1 }
 0x332   :  { %v3721_v46 = vadd.f32 %v2749_v7, %v1055_v49  ;;  %v2751_v31 = vpop.f32.mrb[25].mxu1 }
 0x333   :  { %v3722_v8 = vadd.f32 %v2751_v31, %v1059_v6  ;;  %v2753_v10 = vpop.f32.mrb[26].mxu1 }
 0x334   :  { %v3723_v12 = vadd.f32 %v2753_v10, %v1055_v49  ;;  %v2755_v51 = vpop.f32.mrb[27].mxu1  ;;  %v2770_v27 = vmax.f32 %v3721_v46, 0.0 }
 0x335   :  { %v3724_v23 = vadd.f32 %v2755_v51, %v1059_v6  ;;  %v2771_v19 = vmax.f32 %v3722_v8, 0.0 }
 0x336   :  { %v2774_v32 = vmax.f32 %v3723_v12, 0.0 }
 0x337   :  { %v2775_v54 = vmax.f32 %v3724_v23, 0.0 }
 0x338   :  { %v2786_v24 = vpack.c.bf16 %v2774_v32, %v2770_v27 }
 0x339   :  { %v2787_v35 = vpack.c.bf16 %v2775_v54, %v2771_v19  ;;  %v2759_v0 = vpop.f32.mrb[28].mxu1 }
 0x33a   :  { %v3725_v16 = vadd.f32 %v2759_v0, %v1055_v49  ;;  %v2761_v25 = vpop.f32.mrb[29].mxu1 }
 0x33b   :  { %v3726_v13 = vadd.f32 %v2761_v25, %v1059_v6  ;;  %v2763_v9 = vpop.f32.mrb[30].mxu1  ;;  %3273 = vmatprep.mubr.bf16.mxu0 %v2787_v35 }
 0x33c   :  { %v3727_v18 = vadd.f32 %v2763_v9, %v1055_v49  ;;  %v2765_v1 = vpop.f32.mrb[31].mxu1  ;;  %3274 = vmatmul.mubr.bf16.vlgmr.msra.gmra.mrb[24].mxu0 %v2786_v24  ;;  %v2778_v20 = vmax.f32 %v3725_v16, 0.0 }
 0x33d   :  { %v3728_v41 = vadd.f32 %v2765_v1, %v1059_v6  ;;  %v2779_v30 = vmax.f32 %v3726_v13, 0.0 }
 0x33e   :  { %v2782_v28 = vmax.f32 %v3727_v18, 0.0 }
 0x33f   :  { %v2783_v22 = vmax.f32 %v3728_v41, 0.0 }
 0x340   :  { %v2790_v33 = vpack.c.bf16 %v2782_v28, %v2778_v20 }
 0x341   :  { %v2791_v29 = vpack.c.bf16 %v2783_v22, %v2779_v30 }
 0x343   :  { %3283 = vmatprep.mubr.bf16.mxu0 %v2791_v29 }
 0x344   :  { %3284 = vmatmul.mubr.bf16.gmra.mrb[28].mxu0 %v2790_v33 }
 0x40f   :  { %v3275_v39 = vpop.f32.mrb[24].mxu0 }
 0x410   :  { %v3729_v40 = vadd.f32 %v3275_v39, %v2861_v36  ;;  %v3277_v43 = vpop.f32.mrb[25].mxu0 }
 0x411   :  { %v3730_v42 = vadd.f32 %v3277_v43, %v2865_v38  ;;  %v3279_v45 = vpop.f32.mrb[26].mxu0 }
 0x412   :  { %3294 = vst [vmem:[#allocation11] sm:$0xff] %v3729_v40  ;;  %v3731_v47 = vadd.f32 %v3279_v45, %v2861_v36  ;;  %v3281_v48 = vpop.f32.mrb[27].mxu0 }
 0x413   :  { %3295 = vst [vmem:[#allocation11 + $0x8] sm:$0xff] %v3730_v42  ;;  %v3732_v53 = vadd.f32 %v3281_v48, %v2865_v38 }
 0x414   :  { %3296 = vst [vmem:[#allocation11 + $0x10] sm:$0xff] %v3731_v47 }
 0x415   :  { %3297 = vst [vmem:[#allocation11 + $0x18] sm:$0xff] %v3732_v53 }
 0x417   :  { %v3285_v55 = vpop.f32.mrb[28].mxu0 }
 0x418   :  { %v3733_v56 = vadd.f32 %v3285_v55, %v2861_v36  ;;  %v3287_v57 = vpop.f32.mrb[29].mxu0 }
 0x419   :  { %v3734_v14 = vadd.f32 %v3287_v57, %v2865_v38  ;;  %v3289_v58 = vpop.f32.mrb[30].mxu0 }
 0x41a   :  { %3298 = vst [vmem:[#allocation11 + $0x20] sm:$0xff] %v3733_v56  ;;  %v3735_v17 = vadd.f32 %v3289_v58, %v2861_v36  ;;  %v3291_v59 = vpop.f32.mrb[31].mxu0 }
 0x41b   :  { %3299 = vst [vmem:[#allocation11 + $0x28] sm:$0xff] %v3734_v14  ;;  %v3736_v60 = vadd.f32 %v3291_v59, %v2865_v38 }
 0x41c   :  { %3300 = vst [vmem:[#allocation11 + $0x30] sm:$0xff] %v3735_v17 }
 0x41d   :  { %3301 = vst [vmem:[#allocation11 + $0x38] sm:$0xff] %v3736_v60 }
 0x41e   :  { %4399 = shalt.err (!%p4396_p2)
}
 0x41f   :  { %s4400_s23 = scalar_lea.hbm %s4740_s7, 1024 }
 0x420   :  { %p4401_p3 = scmp.ne.s32.totalorder %s4740_s7, %s4400_s23  ;;  %p4404_p4 = scmp.lt.u32.totalorder %s4400_s23, %s4740_s7 }
 0x422   :  { %p4406_p5 = pnand %p4404_p4, %p4401_p3 }
 0x424   :  { %4409 = shalt.err (!%p4406_p5)
}
 0x425   :  { %3313 = dma.vmem_to_hbm [thread:$0]  %s3308_s19, 1024, %s4740_s7, [#allocation4], %s4422_s1, %s4422_s1, %s4423_s25  }
 0x426   :  { %4416 = dma.done.wait [#allocation4], 1024  }
 0x427   :  { %4417 = vsyncadd [#allocation4], 4294966272 }
 0x428   :  { %3317 = vsyncpa [#allocation3], 1 }
 0x429   :  { %3318 = vsyncpa [#allocation6], 1 }
 0x42a   :  { %3319 = vsyncpa [#allocation9], 1 }
 0x42b   :  { %3320 = vsyncpa [#allocation4], 1 }

</bundles_post_ra>
